<compile_context>
chip_gen: v6e
topology: v6e:2x2x1
jax: 0.10.0
libtpu: 0.0.40
codegen_flags: <defaults>
</compile_context>

<pallas_src>
import jax
import jax.numpy as jnp
from jax import lax
from jax.experimental import pallas as pl
from jax.experimental.pallas import tpu as pltpu


# ----------------------------- model hyper-params (small) -----------------------------
NUM_HIDDENS = 2
INITIAL_NODE = 64           # nodes: [64, 32, 16]
GRU_LAYERS = 2
GRU_SIZE = 32
RNN_INPUT = 8
DNN_INPUT = 16
BATCH = 4
SEQ = 8

H = GRU_SIZE
NODES = [INITIAL_NODE, INITIAL_NODE // 2, INITIAL_NODE // 4]   # [64, 32, 16]
MLP_IN = DNN_INPUT + H                                         # 48
B_PAD = 8                                                      # one full sublane tile

# ---- packed-parameter layout (every block starts at a multiple of 128 lanes) ----
# GRU weights pack: (2H, GW_COLS), bf16
GW_IH0 = 0                       # wih0^T  (RNN_INPUT, 3H)
GW_IH1 = 128                     # wih1^T  (H, 3H)
GW_HH = 256                      # block-diag [whh0^T | 0(32) | 0 ; 0 | 0 | whh1^T]  (2H, 7H)
GH1_OFF = 4 * H                  # layer-1 gate block starts at lane 128 inside the HH region
GW_COLS = GW_HH + 7 * H          # 480
# GRU bias pack: (1, GB_COLS), f32
GB_HH = 0                        # [bhh0 (96) | zeros (32) | bhh1 (96)]
GB_IH0 = 256                     # bih0 (3H)
GB_IH1 = 384                     # bih1 (3H)
GB_COLS = GB_IH1 + 3 * H         # 480
# MLP weights pack: (MLP_IN, MW_COLS) bf16, MLP bias pack: (1, MW_COLS) f32
MW_F = 0                         # fused (merge @ hiddens[0]) W (48, 32) / b (32)
MW_H1 = 128                      # hiddens[1] W^T (32, 16) / b (16)
MW_O = 256                       # out        W^T (16, 2)  / b (2)
MW_COLS = MW_O + 2               # 258


def inclusive_kernel(particles_ref, hlf_ref, gru_w_ref, gru_b_ref,
                     mlp_w_ref, mlp_b_ref, out_ref):
    """Whole forward pass in one kernel (all operands resident in VMEM)."""
    Bp = hlf_ref.shape[0]                    # padded batch (8)
    TB = particles_ref.shape[0]
    T = TB // Bp
    NF = particles_ref.shape[1]
    bf16 = jnp.bfloat16

    # ---- one-time static slices of packed parameters (weights bf16, biases f32) ----
    wih0 = gru_w_ref[0:NF, GW_IH0:GW_IH0 + 3 * H]             # (8, 96)   bf16
    wih1 = gru_w_ref[0:H, GW_IH1:GW_IH1 + 3 * H]              # (32, 96)  bf16
    whh = gru_w_ref[0:2 * H, GW_HH:GW_HH + 7 * H]             # (64, 224) bf16, block-diag
    bhh = gru_b_ref[:, GB_HH:GB_HH + 7 * H]                   # (1, 224)  f32
    bih0 = gru_b_ref[:, GB_IH0:GB_IH0 + 3 * H]                # (1, 96)   f32
    bih1 = gru_b_ref[:, GB_IH1:GB_IH1 + 3 * H]                # (1, 96)   f32

    # ---- hoist the layer-0 input projection for ALL timesteps out of the loop ----
    gi0_all = jnp.dot(particles_ref[...], wih0,
                      preferred_element_type=jnp.float32) + bih0   # (T*Bp, 3H) f32

    def gru_gates(gi, gh, h_prev):
        # PyTorch gate order along the 3H axis: [r, z, n]; fuse r/z into one sigmoid call.
        rz = jax.nn.sigmoid(gi[:, 0:2 * H] + gh[:, 0:2 * H])
        r = rz[:, 0:H]
        z = rz[:, H:2 * H]
        n = jnp.tanh(gi[:, 2 * H:3 * H] + r * gh[:, 2 * H:3 * H])
        return (1.0 - z) * n + z * h_prev

    h0 = jnp.zeros((Bp, H), jnp.float32)
    h1 = jnp.zeros((Bp, H), jnp.float32)
    h_cat = jnp.zeros((Bp, 2 * H), jnp.float32)               # [h0 | h1]

    # Time loop fully unrolled (T static): 2 dependent bf16 MXU ops per step
    # (merged block-diag hidden-to-hidden GEMM, then layer-1 input GEMM).
    for t in range(T):
        gh = jnp.dot(h_cat.astype(bf16), whh,
                     preferred_element_type=jnp.float32) + bhh                 # (Bp, 224)
        h0 = gru_gates(gi0_all[t * Bp:(t + 1) * Bp, :], gh[:, 0:3 * H], h0)    # layer 0
        gi1 = jnp.dot(h0.astype(bf16), wih1,
                      preferred_element_type=jnp.float32) + bih1
        h1 = gru_gates(gi1, gh[:, GH1_OFF:GH1_OFF + 3 * H], h1)                # layer 1
        h_cat = jnp.concatenate([h0, h1], axis=1)

    # ---- MLP head (merge fused into hiddens[0] offline; eval-mode dropout == identity) ----
    wf = mlp_w_ref[0:MLP_IN, MW_F:MW_F + NODES[1]]            # (48, 32) bf16
    wh1 = mlp_w_ref[0:NODES[1], MW_H1:MW_H1 + NODES[2]]       # (32, 16) bf16
    wo = mlp_w_ref[0:NODES[2], MW_O:MW_O + 2]                 # (16, 2)  bf16
    bfu = mlp_b_ref[:, MW_F:MW_F + NODES[1]]                  # f32
    bh1 = mlp_b_ref[:, MW_H1:MW_H1 + NODES[2]]
    bo = mlp_b_ref[:, MW_O:MW_O + 2]

    # x = cat(hlf, hgru[-1]) -> fused(merge->hiddens[0])+ReLU -> hiddens[1]+ReLU -> out
    x = jnp.concatenate([hlf_ref[...], h1], axis=1)                            # (Bp, 48) f32
    x = jnp.maximum(jnp.dot(x.astype(bf16), wf,
                            preferred_element_type=jnp.float32) + bfu, 0.0)    # (Bp, 32)
    x = jnp.maximum(jnp.dot(x.astype(bf16), wh1,
                            preferred_element_type=jnp.float32) + bh1, 0.0)    # (Bp, 16)
    logits = jnp.dot(x.astype(bf16), wo,
                     preferred_element_type=jnp.float32) + bo                  # (Bp, 2)

    # log_softmax(dim=1), numerically stable
    m = jnp.max(logits, axis=1, keepdims=True)
    s = logits - m
    lse = jnp.log(jnp.sum(jnp.exp(s), axis=1, keepdims=True))
    out_ref[...] = s - lse


def init_params(key):
    """Deterministic synthetic parameters matching the nn.Module (PyTorch layout)."""
    def nrm(key, shape, scale=0.1):
        return scale * jax.random.normal(key, shape, dtype=jnp.float32)

    keys = iter(jax.random.split(key, 32))
    p = {}
    # GRU layer 0: weight_ih (3H, RNN_INPUT), weight_hh (3H, H), biases (3H,)
    p["wih0"] = nrm(next(keys), (3 * H, RNN_INPUT))
    p["whh0"] = nrm(next(keys), (3 * H, H))
    p["bih0"] = nrm(next(keys), (3 * H,))
    p["bhh0"] = nrm(next(keys), (3 * H,))
    # GRU layer 1: input is H
    p["wih1"] = nrm(next(keys), (3 * H, H))
    p["whh1"] = nrm(next(keys), (3 * H, H))
    p["bih1"] = nrm(next(keys), (3 * H,))
    p["bhh1"] = nrm(next(keys), (3 * H,))
    # merge: Linear(DNN_INPUT + H, INITIAL_NODE)
    p["wm"] = nrm(next(keys), (NODES[0], MLP_IN))
    p["bm"] = nrm(next(keys), (NODES[0],))
    # hiddens: Linear(64->32), Linear(32->16)
    p["wh0"] = nrm(next(keys), (NODES[1], NODES[0]))
    p["bh0"] = nrm(next(keys), (NODES[1],))
    p["wh1"] = nrm(next(keys), (NODES[2], NODES[1]))
    p["bh1"] = nrm(next(keys), (NODES[2],))
    # out: Linear(16, 2)
    p["wo"] = nrm(next(keys), (2, NODES[2]))
    p["bo"] = nrm(next(keys), (2,))
    return p


def prepare_params(p):
    """One-time repack of PyTorch-layout params into the kernel's packed, pre-transposed,
    128-lane-aligned layout.  Weights stored bf16 (MXU operands), biases kept f32.
    NOTE: the merge->hiddens[0] fusion is only valid in eval mode (dropout == identity)."""
    f32 = jnp.float32
    bf16 = jnp.bfloat16

    def tr(w):  # (out, in) -> (in, out)
        return jnp.asarray(w, f32).T

    gru_w = jnp.zeros((2 * H, GW_COLS), f32)
    gru_w = gru_w.at[0:RNN_INPUT, GW_IH0:GW_IH0 + 3 * H].set(tr(p["wih0"]))
    gru_w = gru_w.at[0:H, GW_IH1:GW_IH1 + 3 * H].set(tr(p["wih1"]))
    # block-diag HH with the layer-1 block lane-aligned at offset 128 (GH1_OFF)
    gru_w = gru_w.at[0:H, GW_HH:GW_HH + 3 * H].set(tr(p["whh0"]))
    gru_w = gru_w.at[H:2 * H, GW_HH + GH1_OFF:GW_HH + GH1_OFF + 3 * H].set(tr(p["whh1"]))
    gru_w = gru_w.astype(bf16)

    gru_b = jnp.zeros((1, GB_COLS), f32)
    gru_b = gru_b.at[0, GB_HH:GB_HH + 3 * H].set(p["bhh0"].astype(f32))
    gru_b = gru_b.at[0, GB_HH + GH1_OFF:GB_HH + GH1_OFF + 3 * H].set(p["bhh1"].astype(f32))
    gru_b = gru_b.at[0, GB_IH0:GB_IH0 + 3 * H].set(p["bih0"].astype(f32))
    gru_b = gru_b.at[0, GB_IH1:GB_IH1 + 3 * H].set(p["bih1"].astype(f32))

    # fuse merge into hiddens[0] (no activation between them in eval mode)
    w_fused = tr(p["wm"]) @ tr(p["wh0"])                         # (48, 64) @ (64, 32) -> (48, 32)
    b_fused = p["bm"].astype(f32) @ tr(p["wh0"]) + p["bh0"].astype(f32)

    mlp_w = jnp.zeros((MLP_IN, MW_COLS), f32)
    mlp_w = mlp_w.at[0:MLP_IN, MW_F:MW_F + NODES[1]].set(w_fused)
    mlp_w = mlp_w.at[0:NODES[1], MW_H1:MW_H1 + NODES[2]].set(tr(p["wh1"]))
    mlp_w = mlp_w.at[0:NODES[2], MW_O:MW_O + 2].set(tr(p["wo"]))
    mlp_w = mlp_w.astype(bf16)

    mlp_b = jnp.zeros((1, MW_COLS), f32)
    mlp_b = mlp_b.at[0, MW_F:MW_F + NODES[1]].set(b_fused)
    mlp_b = mlp_b.at[0, MW_H1:MW_H1 + NODES[2]].set(p["bh1"].astype(f32))
    mlp_b = mlp_b.at[0, MW_O:MW_O + 2].set(p["bo"].astype(f32))

    return {"gru_w": gru_w, "gru_b": gru_b, "mlp_w": mlp_w, "mlp_b": mlp_b}


@jax.jit
def inclusive_forward(particles, hlf, packed):
    """particles: (B, T, RNN_INPUT); hlf: (B, DNN_INPUT); packed: prepare_params() output.
    Returns (B, 2) log-probabilities."""
    B, T, NF = particles.shape
    # Per-call data prep (single tiny fusion): time-major flatten + pad batch to one
    # full 8-row sublane tile + bf16 cast for the MXU LHS.
    p_tm = jnp.transpose(particles, (1, 0, 2))                           # (T, B, F)
    p_tm = jnp.pad(p_tm, ((0, 0), (0, B_PAD - B), (0, 0)))               # (T, 8, F)
    p_tm = p_tm.reshape(T * B_PAD, NF).astype(jnp.bfloat16)
    hlf_p = jnp.pad(hlf.astype(jnp.float32), ((0, B_PAD - B), (0, 0)))   # (8, DNN_INPUT)

    inputs = (p_tm, hlf_p,
              packed["gru_w"], packed["gru_b"], packed["mlp_w"], packed["mlp_b"])
    vmem = pl.BlockSpec(memory_space=pltpu.MemorySpace.VMEM)

    out = pl.pallas_call(
        inclusive_kernel,
        out_shape=jax.ShapeDtypeStruct((B_PAD, 2), jnp.float32),
        in_specs=[vmem] * len(inputs),
        out_specs=vmem,
    )(*inputs)
    return out[:B]


def reference_forward(particles, hlf, p):
    """Pure-JAX reference mirroring the PyTorch module in eval() mode (PyTorch param layout)."""
    B, T, _ = particles.shape
    hp = lax.Precision.HIGHEST

    def cell(x, h, wih, whh, bih, bhh):
        gi = jnp.dot(x, wih.T, precision=hp) + bih
        gh = jnp.dot(h, whh.T, precision=hp) + bhh
        r = jax.nn.sigmoid(gi[:, 0:H] + gh[:, 0:H])
        z = jax.nn.sigmoid(gi[:, H:2 * H] + gh[:, H:2 * H])
        n = jnp.tanh(gi[:, 2 * H:3 * H] + r * gh[:, 2 * H:3 * H])
        return (1.0 - z) * n + z * h

    h0 = jnp.zeros((B, H), jnp.float32)
    h1 = jnp.zeros((B, H), jnp.float32)
    for t in range(T):
        x_t = particles[:, t, :]
        h0 = cell(x_t, h0, p["wih0"], p["whh0"], p["bih0"], p["bhh0"])
        h1 = cell(h0, h1, p["wih1"], p["whh1"], p["bih1"], p["bhh1"])

    x = jnp.concatenate([hlf, h1], axis=1)
    x = jnp.dot(x, p["wm"].T, precision=hp) + p["bm"]
    x = jax.nn.relu(jnp.dot(x, p["wh0"].T, precision=hp) + p["bh0"])
    x = jax.nn.relu(jnp.dot(x, p["wh1"].T, precision=hp) + p["bh1"])
    logits = jnp.dot(x, p["wo"].T, precision=hp) + p["bo"]
    return jax.nn.log_softmax(logits, axis=1)


if __name__ == "__main__":
    key = jax.random.PRNGKey(0)
    k_par, k_hlf, k_params = jax.random.split(key, 3)

    particles = jax.random.normal(k_par, (BATCH, SEQ, RNN_INPUT), dtype=jnp.float32)
    hlf = jax.random.normal(k_hlf, (BATCH, DNN_INPUT), dtype=jnp.float32)
    params = init_params(k_params)
    packed = prepare_params(params)          # one-time: transpose + fuse + pack parameters

    out = inclusive_forward(particles, hlf, packed)
    out = jax.block_until_ready(out)

    assert out.shape == (BATCH, 2)
    assert bool(jnp.all(jnp.isfinite(out)))
    # log_softmax sanity: rows should exp-sum to ~1
    assert bool(jnp.allclose(jnp.sum(jnp.exp(out), axis=1), 1.0, atol=1e-4))
    # correctness vs pure-JAX f32 reference (guards against packing/fusion/layout bugs;
    # tolerance accounts for bf16 MXU operands)
    ref = reference_forward(particles, hlf, params)
    assert bool(jnp.allclose(out, ref, atol=5e-2, rtol=5e-2))

    print("KERNEL_OK")
</pallas_src>

<mosaic_0001>
module attributes {stable_mosaic.version = 11 : i64} {
  func.func @inclusive_kernel(%arg0: memref<64x8xbf16, #tpu.memory_space<vmem>>, %arg1: memref<8x16xf32, #tpu.memory_space<vmem>>, %arg2: memref<64x480xbf16, #tpu.memory_space<vmem>>, %arg3: memref<1x480xf32, #tpu.memory_space<vmem>>, %arg4: memref<48x258xbf16, #tpu.memory_space<vmem>>, %arg5: memref<1x258xf32, #tpu.memory_space<vmem>>, %arg6: memref<8x2xf32, #tpu.memory_space<vmem>>) attributes {dimension_semantics = [], scalar_prefetch = 0 : i64, scratch_operands = 0 : i64, tpu.core_type = #tpu.core_type<tc>} {
    %c0 = arith.constant 0 : index
    %c0_0 = arith.constant 0 : index
    %0 = vector.load %arg2[%c0, %c0_0] : memref<64x480xbf16, #tpu.memory_space<vmem>>, vector<8x96xbf16>
    %c0_1 = arith.constant 0 : index
    %c128 = arith.constant 128 : index
    %1 = vector.load %arg2[%c0_1, %c128] : memref<64x480xbf16, #tpu.memory_space<vmem>>, vector<32x96xbf16>
    %c0_2 = arith.constant 0 : index
    %c256 = arith.constant 256 : index
    %2 = vector.load %arg2[%c0_2, %c256] : memref<64x480xbf16, #tpu.memory_space<vmem>>, vector<64x224xbf16>
    %c0_3 = arith.constant 0 : index
    %c0_4 = arith.constant 0 : index
    %3 = vector.load %arg3[%c0_3, %c0_4] : memref<1x480xf32, #tpu.memory_space<vmem>>, vector<1x224xf32>
    %c0_5 = arith.constant 0 : index
    %c256_6 = arith.constant 256 : index
    %4 = vector.load %arg3[%c0_5, %c256_6] : memref<1x480xf32, #tpu.memory_space<vmem>>, vector<1x96xf32>
    %c0_7 = arith.constant 0 : index
    %c384 = arith.constant 384 : index
    %5 = vector.load %arg3[%c0_7, %c384] : memref<1x480xf32, #tpu.memory_space<vmem>>, vector<1x96xf32>
    %c0_8 = arith.constant 0 : index
    %c0_9 = arith.constant 0 : index
    %6 = vector.load %arg0[%c0_8, %c0_9] : memref<64x8xbf16, #tpu.memory_space<vmem>>, vector<64x8xbf16>
    %cst = arith.constant dense<0.000000e+00> : vector<64x96xf32>
    %7 = tpu.matmul %6, %0, %cst {dimension_numbers = #tpu.dot_dimension_numbers<[1], [0], [0], [1], [0, 0, 1, 1], [], []>} : vector<64x8xbf16>, vector<8x96xbf16>, vector<64x96xf32> -> vector<64x96xf32>
    %8 = vector.broadcast %4 : vector<1x96xf32> to vector<64x96xf32>
    %9 = arith.addf %7, %8 : vector<64x96xf32>
    %cst_10 = arith.constant 0.000000e+00 : f32
    %10 = vector.broadcast %cst_10 : f32 to vector<8x32xf32>
    %cst_11 = arith.constant 0.000000e+00 : f32
    %11 = vector.broadcast %cst_11 : f32 to vector<8x32xf32>
    %cst_12 = arith.constant 0.000000e+00 : f32
    %12 = vector.broadcast %cst_12 : f32 to vector<8x64xf32>
    %13 = arith.truncf %12 : vector<8x64xf32> to vector<8x64xbf16>
    %cst_13 = arith.constant dense<0.000000e+00> : vector<8x224xf32>
    %14 = tpu.matmul %13, %2, %cst_13 {dimension_numbers = #tpu.dot_dimension_numbers<[1], [0], [0], [1], [0, 0, 1, 1], [], []>} : vector<8x64xbf16>, vector<64x224xbf16>, vector<8x224xf32> -> vector<8x224xf32>
    %15 = vector.broadcast %3 : vector<1x224xf32> to vector<8x224xf32>
    %16 = arith.addf %14, %15 : vector<8x224xf32>
    %17 = vector.extract_strided_slice %9 {offsets = [0, 0], sizes = [8, 96], strides = [1, 1]} : vector<64x96xf32> to vector<8x96xf32>
    %18 = vector.extract_strided_slice %16 {offsets = [0, 0], sizes = [8, 96], strides = [1, 1]} : vector<8x224xf32> to vector<8x96xf32>
    %19 = vector.extract_strided_slice %17 {offsets = [0, 0], sizes = [8, 64], strides = [1, 1]} : vector<8x96xf32> to vector<8x64xf32>
    %20 = vector.extract_strided_slice %18 {offsets = [0, 0], sizes = [8, 64], strides = [1, 1]} : vector<8x96xf32> to vector<8x64xf32>
    %21 = arith.addf %19, %20 : vector<8x64xf32>
    %22 = arith.negf %21 : vector<8x64xf32>
    %23 = math.exp %22 : vector<8x64xf32>
    %cst_14 = arith.constant 1.000000e+00 : f32
    %24 = vector.broadcast %cst_14 : f32 to vector<8x64xf32>
    %25 = arith.addf %24, %23 : vector<8x64xf32>
    %26 = arith.divf %24, %25 : vector<8x64xf32>
    %27 = vector.extract_strided_slice %26 {offsets = [0, 0], sizes = [8, 32], strides = [1, 1]} : vector<8x64xf32> to vector<8x32xf32>
    %28 = vector.extract_strided_slice %26 {offsets = [0, 32], sizes = [8, 32], strides = [1, 1]} : vector<8x64xf32> to vector<8x32xf32>
    %29 = vector.extract_strided_slice %17 {offsets = [0, 64], sizes = [8, 32], strides = [1, 1]} : vector<8x96xf32> to vector<8x32xf32>
    %30 = vector.extract_strided_slice %18 {offsets = [0, 64], sizes = [8, 32], strides = [1, 1]} : vector<8x96xf32> to vector<8x32xf32>
    %31 = arith.mulf %27, %30 : vector<8x32xf32>
    %32 = arith.addf %29, %31 : vector<8x32xf32>
    %33 = math.tanh %32 : vector<8x32xf32>
    %cst_15 = arith.constant 1.000000e+00 : f32
    %34 = vector.broadcast %cst_15 : f32 to vector<8x32xf32>
    %35 = arith.subf %34, %28 : vector<8x32xf32>
    %36 = arith.mulf %35, %33 : vector<8x32xf32>
    %37 = arith.mulf %28, %10 : vector<8x32xf32>
    %38 = arith.addf %36, %37 : vector<8x32xf32>
    %39 = arith.truncf %38 : vector<8x32xf32> to vector<8x32xbf16>
    %cst_16 = arith.constant dense<0.000000e+00> : vector<8x96xf32>
    %40 = tpu.matmul %39, %1, %cst_16 {dimension_numbers = #tpu.dot_dimension_numbers<[1], [0], [0], [1], [0, 0, 1, 1], [], []>} : vector<8x32xbf16>, vector<32x96xbf16>, vector<8x96xf32> -> vector<8x96xf32>
    %41 = vector.broadcast %5 : vector<1x96xf32> to vector<8x96xf32>
    %42 = arith.addf %40, %41 : vector<8x96xf32>
    %43 = vector.extract_strided_slice %16 {offsets = [0, 128], sizes = [8, 96], strides = [1, 1]} : vector<8x224xf32> to vector<8x96xf32>
    %44 = vector.extract_strided_slice %42 {offsets = [0, 0], sizes = [8, 64], strides = [1, 1]} : vector<8x96xf32> to vector<8x64xf32>
    %45 = vector.extract_strided_slice %43 {offsets = [0, 0], sizes = [8, 64], strides = [1, 1]} : vector<8x96xf32> to vector<8x64xf32>
    %46 = arith.addf %44, %45 : vector<8x64xf32>
    %47 = arith.negf %46 : vector<8x64xf32>
    %48 = math.exp %47 : vector<8x64xf32>
    %cst_17 = arith.constant 1.000000e+00 : f32
    %49 = vector.broadcast %cst_17 : f32 to vector<8x64xf32>
    %50 = arith.addf %49, %48 : vector<8x64xf32>
    %51 = arith.divf %49, %50 : vector<8x64xf32>
    %52 = vector.extract_strided_slice %51 {offsets = [0, 0], sizes = [8, 32], strides = [1, 1]} : vector<8x64xf32> to vector<8x32xf32>
    %53 = vector.extract_strided_slice %51 {offsets = [0, 32], sizes = [8, 32], strides = [1, 1]} : vector<8x64xf32> to vector<8x32xf32>
    %54 = vector.extract_strided_slice %42 {offsets = [0, 64], sizes = [8, 32], strides = [1, 1]} : vector<8x96xf32> to vector<8x32xf32>
    %55 = vector.extract_strided_slice %43 {offsets = [0, 64], sizes = [8, 32], strides = [1, 1]} : vector<8x96xf32> to vector<8x32xf32>
    %56 = arith.mulf %52, %55 : vector<8x32xf32>
    %57 = arith.addf %54, %56 : vector<8x32xf32>
    %58 = math.tanh %57 : vector<8x32xf32>
    %cst_18 = arith.constant 1.000000e+00 : f32
    %59 = vector.broadcast %cst_18 : f32 to vector<8x32xf32>
    %60 = arith.subf %59, %53 : vector<8x32xf32>
    %61 = arith.mulf %60, %58 : vector<8x32xf32>
    %62 = arith.mulf %53, %11 : vector<8x32xf32>
    %63 = arith.addf %61, %62 : vector<8x32xf32>
    %64 = tpu.concatenate %38, %63 in 1 : vector<8x32xf32>, vector<8x32xf32> -> vector<8x64xf32>
    %65 = arith.truncf %64 : vector<8x64xf32> to vector<8x64xbf16>
    %cst_19 = arith.constant dense<0.000000e+00> : vector<8x224xf32>
    %66 = tpu.matmul %65, %2, %cst_19 {dimension_numbers = #tpu.dot_dimension_numbers<[1], [0], [0], [1], [0, 0, 1, 1], [], []>} : vector<8x64xbf16>, vector<64x224xbf16>, vector<8x224xf32> -> vector<8x224xf32>
    %67 = vector.broadcast %3 : vector<1x224xf32> to vector<8x224xf32>
    %68 = arith.addf %66, %67 : vector<8x224xf32>
    %69 = vector.extract_strided_slice %9 {offsets = [8, 0], sizes = [8, 96], strides = [1, 1]} : vector<64x96xf32> to vector<8x96xf32>
    %70 = vector.extract_strided_slice %68 {offsets = [0, 0], sizes = [8, 96], strides = [1, 1]} : vector<8x224xf32> to vector<8x96xf32>
    %71 = vector.extract_strided_slice %69 {offsets = [0, 0], sizes = [8, 64], strides = [1, 1]} : vector<8x96xf32> to vector<8x64xf32>
    %72 = vector.extract_strided_slice %70 {offsets = [0, 0], sizes = [8, 64], strides = [1, 1]} : vector<8x96xf32> to vector<8x64xf32>
    %73 = arith.addf %71, %72 : vector<8x64xf32>
    %74 = arith.negf %73 : vector<8x64xf32>
    %75 = math.exp %74 : vector<8x64xf32>
    %cst_20 = arith.constant 1.000000e+00 : f32
    %76 = vector.broadcast %cst_20 : f32 to vector<8x64xf32>
    %77 = arith.addf %76, %75 : vector<8x64xf32>
    %78 = arith.divf %76, %77 : vector<8x64xf32>
    %79 = vector.extract_strided_slice %78 {offsets = [0, 0], sizes = [8, 32], strides = [1, 1]} : vector<8x64xf32> to vector<8x32xf32>
    %80 = vector.extract_strided_slice %78 {offsets = [0, 32], sizes = [8, 32], strides = [1, 1]} : vector<8x64xf32> to vector<8x32xf32>
    %81 = vector.extract_strided_slice %69 {offsets = [0, 64], sizes = [8, 32], strides = [1, 1]} : vector<8x96xf32> to vector<8x32xf32>
    %82 = vector.extract_strided_slice %70 {offsets = [0, 64], sizes = [8, 32], strides = [1, 1]} : vector<8x96xf32> to vector<8x32xf32>
    %83 = arith.mulf %79, %82 : vector<8x32xf32>
    %84 = arith.addf %81, %83 : vector<8x32xf32>
    %85 = math.tanh %84 : vector<8x32xf32>
    %cst_21 = arith.constant 1.000000e+00 : f32
    %86 = vector.broadcast %cst_21 : f32 to vector<8x32xf32>
    %87 = arith.subf %86, %80 : vector<8x32xf32>
    %88 = arith.mulf %87, %85 : vector<8x32xf32>
    %89 = arith.mulf %80, %38 : vector<8x32xf32>
    %90 = arith.addf %88, %89 : vector<8x32xf32>
    %91 = arith.truncf %90 : vector<8x32xf32> to vector<8x32xbf16>
    %cst_22 = arith.constant dense<0.000000e+00> : vector<8x96xf32>
    %92 = tpu.matmul %91, %1, %cst_22 {dimension_numbers = #tpu.dot_dimension_numbers<[1], [0], [0], [1], [0, 0, 1, 1], [], []>} : vector<8x32xbf16>, vector<32x96xbf16>, vector<8x96xf32> -> vector<8x96xf32>
    %93 = vector.broadcast %5 : vector<1x96xf32> to vector<8x96xf32>
    %94 = arith.addf %92, %93 : vector<8x96xf32>
    %95 = vector.extract_strided_slice %68 {offsets = [0, 128], sizes = [8, 96], strides = [1, 1]} : vector<8x224xf32> to vector<8x96xf32>
    %96 = vector.extract_strided_slice %94 {offsets = [0, 0], sizes = [8, 64], strides = [1, 1]} : vector<8x96xf32> to vector<8x64xf32>
    %97 = vector.extract_strided_slice %95 {offsets = [0, 0], sizes = [8, 64], strides = [1, 1]} : vector<8x96xf32> to vector<8x64xf32>
    %98 = arith.addf %96, %97 : vector<8x64xf32>
    %99 = arith.negf %98 : vector<8x64xf32>
    %100 = math.exp %99 : vector<8x64xf32>
    %cst_23 = arith.constant 1.000000e+00 : f32
    %101 = vector.broadcast %cst_23 : f32 to vector<8x64xf32>
    %102 = arith.addf %101, %100 : vector<8x64xf32>
    %103 = arith.divf %101, %102 : vector<8x64xf32>
    %104 = vector.extract_strided_slice %103 {offsets = [0, 0], sizes = [8, 32], strides = [1, 1]} : vector<8x64xf32> to vector<8x32xf32>
    %105 = vector.extract_strided_slice %103 {offsets = [0, 32], sizes = [8, 32], strides = [1, 1]} : vector<8x64xf32> to vector<8x32xf32>
    %106 = vector.extract_strided_slice %94 {offsets = [0, 64], sizes = [8, 32], strides = [1, 1]} : vector<8x96xf32> to vector<8x32xf32>
    %107 = vector.extract_strided_slice %95 {offsets = [0, 64], sizes = [8, 32], strides = [1, 1]} : vector<8x96xf32> to vector<8x32xf32>
    %108 = arith.mulf %104, %107 : vector<8x32xf32>
    %109 = arith.addf %106, %108 : vector<8x32xf32>
    %110 = math.tanh %109 : vector<8x32xf32>
    %cst_24 = arith.constant 1.000000e+00 : f32
    %111 = vector.broadcast %cst_24 : f32 to vector<8x32xf32>
    %112 = arith.subf %111, %105 : vector<8x32xf32>
    %113 = arith.mulf %112, %110 : vector<8x32xf32>
    %114 = arith.mulf %105, %63 : vector<8x32xf32>
    %115 = arith.addf %113, %114 : vector<8x32xf32>
    %116 = tpu.concatenate %90, %115 in 1 : vector<8x32xf32>, vector<8x32xf32> -> vector<8x64xf32>
    %117 = arith.truncf %116 : vector<8x64xf32> to vector<8x64xbf16>
    %cst_25 = arith.constant dense<0.000000e+00> : vector<8x224xf32>
    %118 = tpu.matmul %117, %2, %cst_25 {dimension_numbers = #tpu.dot_dimension_numbers<[1], [0], [0], [1], [0, 0, 1, 1], [], []>} : vector<8x64xbf16>, vector<64x224xbf16>, vector<8x224xf32> -> vector<8x224xf32>
    %119 = vector.broadcast %3 : vector<1x224xf32> to vector<8x224xf32>
    %120 = arith.addf %118, %119 : vector<8x224xf32>
    %121 = vector.extract_strided_slice %9 {offsets = [16, 0], sizes = [8, 96], strides = [1, 1]} : vector<64x96xf32> to vector<8x96xf32>
    %122 = vector.extract_strided_slice %120 {offsets = [0, 0], sizes = [8, 96], strides = [1, 1]} : vector<8x224xf32> to vector<8x96xf32>
    %123 = vector.extract_strided_slice %121 {offsets = [0, 0], sizes = [8, 64], strides = [1, 1]} : vector<8x96xf32> to vector<8x64xf32>
    %124 = vector.extract_strided_slice %122 {offsets = [0, 0], sizes = [8, 64], strides = [1, 1]} : vector<8x96xf32> to vector<8x64xf32>
    %125 = arith.addf %123, %124 : vector<8x64xf32>
    %126 = arith.negf %125 : vector<8x64xf32>
    %127 = math.exp %126 : vector<8x64xf32>
    %cst_26 = arith.constant 1.000000e+00 : f32
    %128 = vector.broadcast %cst_26 : f32 to vector<8x64xf32>
    %129 = arith.addf %128, %127 : vector<8x64xf32>
    %130 = arith.divf %128, %129 : vector<8x64xf32>
    %131 = vector.extract_strided_slice %130 {offsets = [0, 0], sizes = [8, 32], strides = [1, 1]} : vector<8x64xf32> to vector<8x32xf32>
    %132 = vector.extract_strided_slice %130 {offsets = [0, 32], sizes = [8, 32], strides = [1, 1]} : vector<8x64xf32> to vector<8x32xf32>
    %133 = vector.extract_strided_slice %121 {offsets = [0, 64], sizes = [8, 32], strides = [1, 1]} : vector<8x96xf32> to vector<8x32xf32>
    %134 = vector.extract_strided_slice %122 {offsets = [0, 64], sizes = [8, 32], strides = [1, 1]} : vector<8x96xf32> to vector<8x32xf32>
    %135 = arith.mulf %131, %134 : vector<8x32xf32>
    %136 = arith.addf %133, %135 : vector<8x32xf32>
    %137 = math.tanh %136 : vector<8x32xf32>
    %cst_27 = arith.constant 1.000000e+00 : f32
    %138 = vector.broadcast %cst_27 : f32 to vector<8x32xf32>
    %139 = arith.subf %138, %132 : vector<8x32xf32>
    %140 = arith.mulf %139, %137 : vector<8x32xf32>
    %141 = arith.mulf %132, %90 : vector<8x32xf32>
    %142 = arith.addf %140, %141 : vector<8x32xf32>
    %143 = arith.truncf %142 : vector<8x32xf32> to vector<8x32xbf16>
    %cst_28 = arith.constant dense<0.000000e+00> : vector<8x96xf32>
    %144 = tpu.matmul %143, %1, %cst_28 {dimension_numbers = #tpu.dot_dimension_numbers<[1], [0], [0], [1], [0, 0, 1, 1], [], []>} : vector<8x32xbf16>, vector<32x96xbf16>, vector<8x96xf32> -> vector<8x96xf32>
    %145 = vector.broadcast %5 : vector<1x96xf32> to vector<8x96xf32>
    %146 = arith.addf %144, %145 : vector<8x96xf32>
    %147 = vector.extract_strided_slice %120 {offsets = [0, 128], sizes = [8, 96], strides = [1, 1]} : vector<8x224xf32> to vector<8x96xf32>
    %148 = vector.extract_strided_slice %146 {offsets = [0, 0], sizes = [8, 64], strides = [1, 1]} : vector<8x96xf32> to vector<8x64xf32>
    %149 = vector.extract_strided_slice %147 {offsets = [0, 0], sizes = [8, 64], strides = [1, 1]} : vector<8x96xf32> to vector<8x64xf32>
    %150 = arith.addf %148, %149 : vector<8x64xf32>
    %151 = arith.negf %150 : vector<8x64xf32>
    %152 = math.exp %151 : vector<8x64xf32>
    %cst_29 = arith.constant 1.000000e+00 : f32
    %153 = vector.broadcast %cst_29 : f32 to vector<8x64xf32>
    %154 = arith.addf %153, %152 : vector<8x64xf32>
    %155 = arith.divf %153, %154 : vector<8x64xf32>
    %156 = vector.extract_strided_slice %155 {offsets = [0, 0], sizes = [8, 32], strides = [1, 1]} : vector<8x64xf32> to vector<8x32xf32>
    %157 = vector.extract_strided_slice %155 {offsets = [0, 32], sizes = [8, 32], strides = [1, 1]} : vector<8x64xf32> to vector<8x32xf32>
    %158 = vector.extract_strided_slice %146 {offsets = [0, 64], sizes = [8, 32], strides = [1, 1]} : vector<8x96xf32> to vector<8x32xf32>
    %159 = vector.extract_strided_slice %147 {offsets = [0, 64], sizes = [8, 32], strides = [1, 1]} : vector<8x96xf32> to vector<8x32xf32>
    %160 = arith.mulf %156, %159 : vector<8x32xf32>
    %161 = arith.addf %158, %160 : vector<8x32xf32>
    %162 = math.tanh %161 : vector<8x32xf32>
    %cst_30 = arith.constant 1.000000e+00 : f32
    %163 = vector.broadcast %cst_30 : f32 to vector<8x32xf32>
    %164 = arith.subf %163, %157 : vector<8x32xf32>
    %165 = arith.mulf %164, %162 : vector<8x32xf32>
    %166 = arith.mulf %157, %115 : vector<8x32xf32>
    %167 = arith.addf %165, %166 : vector<8x32xf32>
    %168 = tpu.concatenate %142, %167 in 1 : vector<8x32xf32>, vector<8x32xf32> -> vector<8x64xf32>
    %169 = arith.truncf %168 : vector<8x64xf32> to vector<8x64xbf16>
    %cst_31 = arith.constant dense<0.000000e+00> : vector<8x224xf32>
    %170 = tpu.matmul %169, %2, %cst_31 {dimension_numbers = #tpu.dot_dimension_numbers<[1], [0], [0], [1], [0, 0, 1, 1], [], []>} : vector<8x64xbf16>, vector<64x224xbf16>, vector<8x224xf32> -> vector<8x224xf32>
    %171 = vector.broadcast %3 : vector<1x224xf32> to vector<8x224xf32>
    %172 = arith.addf %170, %171 : vector<8x224xf32>
    %173 = vector.extract_strided_slice %9 {offsets = [24, 0], sizes = [8, 96], strides = [1, 1]} : vector<64x96xf32> to vector<8x96xf32>
    %174 = vector.extract_strided_slice %172 {offsets = [0, 0], sizes = [8, 96], strides = [1, 1]} : vector<8x224xf32> to vector<8x96xf32>
    %175 = vector.extract_strided_slice %173 {offsets = [0, 0], sizes = [8, 64], strides = [1, 1]} : vector<8x96xf32> to vector<8x64xf32>
    %176 = vector.extract_strided_slice %174 {offsets = [0, 0], sizes = [8, 64], strides = [1, 1]} : vector<8x96xf32> to vector<8x64xf32>
    %177 = arith.addf %175, %176 : vector<8x64xf32>
    %178 = arith.negf %177 : vector<8x64xf32>
    %179 = math.exp %178 : vector<8x64xf32>
    %cst_32 = arith.constant 1.000000e+00 : f32
    %180 = vector.broadcast %cst_32 : f32 to vector<8x64xf32>
    %181 = arith.addf %180, %179 : vector<8x64xf32>
    %182 = arith.divf %180, %181 : vector<8x64xf32>
    %183 = vector.extract_strided_slice %182 {offsets = [0, 0], sizes = [8, 32], strides = [1, 1]} : vector<8x64xf32> to vector<8x32xf32>
    %184 = vector.extract_strided_slice %182 {offsets = [0, 32], sizes = [8, 32], strides = [1, 1]} : vector<8x64xf32> to vector<8x32xf32>
    %185 = vector.extract_strided_slice %173 {offsets = [0, 64], sizes = [8, 32], strides = [1, 1]} : vector<8x96xf32> to vector<8x32xf32>
    %186 = vector.extract_strided_slice %174 {offsets = [0, 64], sizes = [8, 32], strides = [1, 1]} : vector<8x96xf32> to vector<8x32xf32>
    %187 = arith.mulf %183, %186 : vector<8x32xf32>
    %188 = arith.addf %185, %187 : vector<8x32xf32>
    %189 = math.tanh %188 : vector<8x32xf32>
    %cst_33 = arith.constant 1.000000e+00 : f32
    %190 = vector.broadcast %cst_33 : f32 to vector<8x32xf32>
    %191 = arith.subf %190, %184 : vector<8x32xf32>
    %192 = arith.mulf %191, %189 : vector<8x32xf32>
    %193 = arith.mulf %184, %142 : vector<8x32xf32>
    %194 = arith.addf %192, %193 : vector<8x32xf32>
    %195 = arith.truncf %194 : vector<8x32xf32> to vector<8x32xbf16>
    %cst_34 = arith.constant dense<0.000000e+00> : vector<8x96xf32>
    %196 = tpu.matmul %195, %1, %cst_34 {dimension_numbers = #tpu.dot_dimension_numbers<[1], [0], [0], [1], [0, 0, 1, 1], [], []>} : vector<8x32xbf16>, vector<32x96xbf16>, vector<8x96xf32> -> vector<8x96xf32>
    %197 = vector.broadcast %5 : vector<1x96xf32> to vector<8x96xf32>
    %198 = arith.addf %196, %197 : vector<8x96xf32>
    %199 = vector.extract_strided_slice %172 {offsets = [0, 128], sizes = [8, 96], strides = [1, 1]} : vector<8x224xf32> to vector<8x96xf32>
    %200 = vector.extract_strided_slice %198 {offsets = [0, 0], sizes = [8, 64], strides = [1, 1]} : vector<8x96xf32> to vector<8x64xf32>
    %201 = vector.extract_strided_slice %199 {offsets = [0, 0], sizes = [8, 64], strides = [1, 1]} : vector<8x96xf32> to vector<8x64xf32>
    %202 = arith.addf %200, %201 : vector<8x64xf32>
    %203 = arith.negf %202 : vector<8x64xf32>
    %204 = math.exp %203 : vector<8x64xf32>
    %cst_35 = arith.constant 1.000000e+00 : f32
    %205 = vector.broadcast %cst_35 : f32 to vector<8x64xf32>
    %206 = arith.addf %205, %204 : vector<8x64xf32>
    %207 = arith.divf %205, %206 : vector<8x64xf32>
    %208 = vector.extract_strided_slice %207 {offsets = [0, 0], sizes = [8, 32], strides = [1, 1]} : vector<8x64xf32> to vector<8x32xf32>
    %209 = vector.extract_strided_slice %207 {offsets = [0, 32], sizes = [8, 32], strides = [1, 1]} : vector<8x64xf32> to vector<8x32xf32>
    %210 = vector.extract_strided_slice %198 {offsets = [0, 64], sizes = [8, 32], strides = [1, 1]} : vector<8x96xf32> to vector<8x32xf32>
    %211 = vector.extract_strided_slice %199 {offsets = [0, 64], sizes = [8, 32], strides = [1, 1]} : vector<8x96xf32> to vector<8x32xf32>
    %212 = arith.mulf %208, %211 : vector<8x32xf32>
    %213 = arith.addf %210, %212 : vector<8x32xf32>
    %214 = math.tanh %213 : vector<8x32xf32>
    %cst_36 = arith.constant 1.000000e+00 : f32
    %215 = vector.broadcast %cst_36 : f32 to vector<8x32xf32>
    %216 = arith.subf %215, %209 : vector<8x32xf32>
    %217 = arith.mulf %216, %214 : vector<8x32xf32>
    %218 = arith.mulf %209, %167 : vector<8x32xf32>
    %219 = arith.addf %217, %218 : vector<8x32xf32>
    %220 = tpu.concatenate %194, %219 in 1 : vector<8x32xf32>, vector<8x32xf32> -> vector<8x64xf32>
    %221 = arith.truncf %220 : vector<8x64xf32> to vector<8x64xbf16>
    %cst_37 = arith.constant dense<0.000000e+00> : vector<8x224xf32>
    %222 = tpu.matmul %221, %2, %cst_37 {dimension_numbers = #tpu.dot_dimension_numbers<[1], [0], [0], [1], [0, 0, 1, 1], [], []>} : vector<8x64xbf16>, vector<64x224xbf16>, vector<8x224xf32> -> vector<8x224xf32>
    %223 = vector.broadcast %3 : vector<1x224xf32> to vector<8x224xf32>
    %224 = arith.addf %222, %223 : vector<8x224xf32>
    %225 = vector.extract_strided_slice %9 {offsets = [32, 0], sizes = [8, 96], strides = [1, 1]} : vector<64x96xf32> to vector<8x96xf32>
    %226 = vector.extract_strided_slice %224 {offsets = [0, 0], sizes = [8, 96], strides = [1, 1]} : vector<8x224xf32> to vector<8x96xf32>
    %227 = vector.extract_strided_slice %225 {offsets = [0, 0], sizes = [8, 64], strides = [1, 1]} : vector<8x96xf32> to vector<8x64xf32>
    %228 = vector.extract_strided_slice %226 {offsets = [0, 0], sizes = [8, 64], strides = [1, 1]} : vector<8x96xf32> to vector<8x64xf32>
    %229 = arith.addf %227, %228 : vector<8x64xf32>
    %230 = arith.negf %229 : vector<8x64xf32>
    %231 = math.exp %230 : vector<8x64xf32>
    %cst_38 = arith.constant 1.000000e+00 : f32
    %232 = vector.broadcast %cst_38 : f32 to vector<8x64xf32>
    %233 = arith.addf %232, %231 : vector<8x64xf32>
    %234 = arith.divf %232, %233 : vector<8x64xf32>
    %235 = vector.extract_strided_slice %234 {offsets = [0, 0], sizes = [8, 32], strides = [1, 1]} : vector<8x64xf32> to vector<8x32xf32>
    %236 = vector.extract_strided_slice %234 {offsets = [0, 32], sizes = [8, 32], strides = [1, 1]} : vector<8x64xf32> to vector<8x32xf32>
    %237 = vector.extract_strided_slice %225 {offsets = [0, 64], sizes = [8, 32], strides = [1, 1]} : vector<8x96xf32> to vector<8x32xf32>
    %238 = vector.extract_strided_slice %226 {offsets = [0, 64], sizes = [8, 32], strides = [1, 1]} : vector<8x96xf32> to vector<8x32xf32>
    %239 = arith.mulf %235, %238 : vector<8x32xf32>
    %240 = arith.addf %237, %239 : vector<8x32xf32>
    %241 = math.tanh %240 : vector<8x32xf32>
    %cst_39 = arith.constant 1.000000e+00 : f32
    %242 = vector.broadcast %cst_39 : f32 to vector<8x32xf32>
    %243 = arith.subf %242, %236 : vector<8x32xf32>
    %244 = arith.mulf %243, %241 : vector<8x32xf32>
    %245 = arith.mulf %236, %194 : vector<8x32xf32>
    %246 = arith.addf %244, %245 : vector<8x32xf32>
    %247 = arith.truncf %246 : vector<8x32xf32> to vector<8x32xbf16>
    %cst_40 = arith.constant dense<0.000000e+00> : vector<8x96xf32>
    %248 = tpu.matmul %247, %1, %cst_40 {dimension_numbers = #tpu.dot_dimension_numbers<[1], [0], [0], [1], [0, 0, 1, 1], [], []>} : vector<8x32xbf16>, vector<32x96xbf16>, vector<8x96xf32> -> vector<8x96xf32>
    %249 = vector.broadcast %5 : vector<1x96xf32> to vector<8x96xf32>
    %250 = arith.addf %248, %249 : vector<8x96xf32>
    %251 = vector.extract_strided_slice %224 {offsets = [0, 128], sizes = [8, 96], strides = [1, 1]} : vector<8x224xf32> to vector<8x96xf32>
    %252 = vector.extract_strided_slice %250 {offsets = [0, 0], sizes = [8, 64], strides = [1, 1]} : vector<8x96xf32> to vector<8x64xf32>
    %253 = vector.extract_strided_slice %251 {offsets = [0, 0], sizes = [8, 64], strides = [1, 1]} : vector<8x96xf32> to vector<8x64xf32>
    %254 = arith.addf %252, %253 : vector<8x64xf32>
    %255 = arith.negf %254 : vector<8x64xf32>
    %256 = math.exp %255 : vector<8x64xf32>
    %cst_41 = arith.constant 1.000000e+00 : f32
    %257 = vector.broadcast %cst_41 : f32 to vector<8x64xf32>
    %258 = arith.addf %257, %256 : vector<8x64xf32>
    %259 = arith.divf %257, %258 : vector<8x64xf32>
    %260 = vector.extract_strided_slice %259 {offsets = [0, 0], sizes = [8, 32], strides = [1, 1]} : vector<8x64xf32> to vector<8x32xf32>
    %261 = vector.extract_strided_slice %259 {offsets = [0, 32], sizes = [8, 32], strides = [1, 1]} : vector<8x64xf32> to vector<8x32xf32>
    %262 = vector.extract_strided_slice %250 {offsets = [0, 64], sizes = [8, 32], strides = [1, 1]} : vector<8x96xf32> to vector<8x32xf32>
    %263 = vector.extract_strided_slice %251 {offsets = [0, 64], sizes = [8, 32], strides = [1, 1]} : vector<8x96xf32> to vector<8x32xf32>
    %264 = arith.mulf %260, %263 : vector<8x32xf32>
    %265 = arith.addf %262, %264 : vector<8x32xf32>
    %266 = math.tanh %265 : vector<8x32xf32>
    %cst_42 = arith.constant 1.000000e+00 : f32
    %267 = vector.broadcast %cst_42 : f32 to vector<8x32xf32>
    %268 = arith.subf %267, %261 : vector<8x32xf32>
    %269 = arith.mulf %268, %266 : vector<8x32xf32>
    %270 = arith.mulf %261, %219 : vector<8x32xf32>
    %271 = arith.addf %269, %270 : vector<8x32xf32>
    %272 = tpu.concatenate %246, %271 in 1 : vector<8x32xf32>, vector<8x32xf32> -> vector<8x64xf32>
    %273 = arith.truncf %272 : vector<8x64xf32> to vector<8x64xbf16>
    %cst_43 = arith.constant dense<0.000000e+00> : vector<8x224xf32>
    %274 = tpu.matmul %273, %2, %cst_43 {dimension_numbers = #tpu.dot_dimension_numbers<[1], [0], [0], [1], [0, 0, 1, 1], [], []>} : vector<8x64xbf16>, vector<64x224xbf16>, vector<8x224xf32> -> vector<8x224xf32>
    %275 = vector.broadcast %3 : vector<1x224xf32> to vector<8x224xf32>
    %276 = arith.addf %274, %275 : vector<8x224xf32>
    %277 = vector.extract_strided_slice %9 {offsets = [40, 0], sizes = [8, 96], strides = [1, 1]} : vector<64x96xf32> to vector<8x96xf32>
    %278 = vector.extract_strided_slice %276 {offsets = [0, 0], sizes = [8, 96], strides = [1, 1]} : vector<8x224xf32> to vector<8x96xf32>
    %279 = vector.extract_strided_slice %277 {offsets = [0, 0], sizes = [8, 64], strides = [1, 1]} : vector<8x96xf32> to vector<8x64xf32>
    %280 = vector.extract_strided_slice %278 {offsets = [0, 0], sizes = [8, 64], strides = [1, 1]} : vector<8x96xf32> to vector<8x64xf32>
    %281 = arith.addf %279, %280 : vector<8x64xf32>
    %282 = arith.negf %281 : vector<8x64xf32>
    %283 = math.exp %282 : vector<8x64xf32>
    %cst_44 = arith.constant 1.000000e+00 : f32
    %284 = vector.broadcast %cst_44 : f32 to vector<8x64xf32>
    %285 = arith.addf %284, %283 : vector<8x64xf32>
    %286 = arith.divf %284, %285 : vector<8x64xf32>
    %287 = vector.extract_strided_slice %286 {offsets = [0, 0], sizes = [8, 32], strides = [1, 1]} : vector<8x64xf32> to vector<8x32xf32>
    %288 = vector.extract_strided_slice %286 {offsets = [0, 32], sizes = [8, 32], strides = [1, 1]} : vector<8x64xf32> to vector<8x32xf32>
    %289 = vector.extract_strided_slice %277 {offsets = [0, 64], sizes = [8, 32], strides = [1, 1]} : vector<8x96xf32> to vector<8x32xf32>
    %290 = vector.extract_strided_slice %278 {offsets = [0, 64], sizes = [8, 32], strides = [1, 1]} : vector<8x96xf32> to vector<8x32xf32>
    %291 = arith.mulf %287, %290 : vector<8x32xf32>
    %292 = arith.addf %289, %291 : vector<8x32xf32>
    %293 = math.tanh %292 : vector<8x32xf32>
    %cst_45 = arith.constant 1.000000e+00 : f32
    %294 = vector.broadcast %cst_45 : f32 to vector<8x32xf32>
    %295 = arith.subf %294, %288 : vector<8x32xf32>
    %296 = arith.mulf %295, %293 : vector<8x32xf32>
    %297 = arith.mulf %288, %246 : vector<8x32xf32>
    %298 = arith.addf %296, %297 : vector<8x32xf32>
    %299 = arith.truncf %298 : vector<8x32xf32> to vector<8x32xbf16>
    %cst_46 = arith.constant dense<0.000000e+00> : vector<8x96xf32>
    %300 = tpu.matmul %299, %1, %cst_46 {dimension_numbers = #tpu.dot_dimension_numbers<[1], [0], [0], [1], [0, 0, 1, 1], [], []>} : vector<8x32xbf16>, vector<32x96xbf16>, vector<8x96xf32> -> vector<8x96xf32>
    %301 = vector.broadcast %5 : vector<1x96xf32> to vector<8x96xf32>
    %302 = arith.addf %300, %301 : vector<8x96xf32>
    %303 = vector.extract_strided_slice %276 {offsets = [0, 128], sizes = [8, 96], strides = [1, 1]} : vector<8x224xf32> to vector<8x96xf32>
    %304 = vector.extract_strided_slice %302 {offsets = [0, 0], sizes = [8, 64], strides = [1, 1]} : vector<8x96xf32> to vector<8x64xf32>
    %305 = vector.extract_strided_slice %303 {offsets = [0, 0], sizes = [8, 64], strides = [1, 1]} : vector<8x96xf32> to vector<8x64xf32>
    %306 = arith.addf %304, %305 : vector<8x64xf32>
    %307 = arith.negf %306 : vector<8x64xf32>
    %308 = math.exp %307 : vector<8x64xf32>
    %cst_47 = arith.constant 1.000000e+00 : f32
    %309 = vector.broadcast %cst_47 : f32 to vector<8x64xf32>
    %310 = arith.addf %309, %308 : vector<8x64xf32>
    %311 = arith.divf %309, %310 : vector<8x64xf32>
    %312 = vector.extract_strided_slice %311 {offsets = [0, 0], sizes = [8, 32], strides = [1, 1]} : vector<8x64xf32> to vector<8x32xf32>
    %313 = vector.extract_strided_slice %311 {offsets = [0, 32], sizes = [8, 32], strides = [1, 1]} : vector<8x64xf32> to vector<8x32xf32>
    %314 = vector.extract_strided_slice %302 {offsets = [0, 64], sizes = [8, 32], strides = [1, 1]} : vector<8x96xf32> to vector<8x32xf32>
    %315 = vector.extract_strided_slice %303 {offsets = [0, 64], sizes = [8, 32], strides = [1, 1]} : vector<8x96xf32> to vector<8x32xf32>
    %316 = arith.mulf %312, %315 : vector<8x32xf32>
    %317 = arith.addf %314, %316 : vector<8x32xf32>
    %318 = math.tanh %317 : vector<8x32xf32>
    %cst_48 = arith.constant 1.000000e+00 : f32
    %319 = vector.broadcast %cst_48 : f32 to vector<8x32xf32>
    %320 = arith.subf %319, %313 : vector<8x32xf32>
    %321 = arith.mulf %320, %318 : vector<8x32xf32>
    %322 = arith.mulf %313, %271 : vector<8x32xf32>
    %323 = arith.addf %321, %322 : vector<8x32xf32>
    %324 = tpu.concatenate %298, %323 in 1 : vector<8x32xf32>, vector<8x32xf32> -> vector<8x64xf32>
    %325 = arith.truncf %324 : vector<8x64xf32> to vector<8x64xbf16>
    %cst_49 = arith.constant dense<0.000000e+00> : vector<8x224xf32>
    %326 = tpu.matmul %325, %2, %cst_49 {dimension_numbers = #tpu.dot_dimension_numbers<[1], [0], [0], [1], [0, 0, 1, 1], [], []>} : vector<8x64xbf16>, vector<64x224xbf16>, vector<8x224xf32> -> vector<8x224xf32>
    %327 = vector.broadcast %3 : vector<1x224xf32> to vector<8x224xf32>
    %328 = arith.addf %326, %327 : vector<8x224xf32>
    %329 = vector.extract_strided_slice %9 {offsets = [48, 0], sizes = [8, 96], strides = [1, 1]} : vector<64x96xf32> to vector<8x96xf32>
    %330 = vector.extract_strided_slice %328 {offsets = [0, 0], sizes = [8, 96], strides = [1, 1]} : vector<8x224xf32> to vector<8x96xf32>
    %331 = vector.extract_strided_slice %329 {offsets = [0, 0], sizes = [8, 64], strides = [1, 1]} : vector<8x96xf32> to vector<8x64xf32>
    %332 = vector.extract_strided_slice %330 {offsets = [0, 0], sizes = [8, 64], strides = [1, 1]} : vector<8x96xf32> to vector<8x64xf32>
    %333 = arith.addf %331, %332 : vector<8x64xf32>
    %334 = arith.negf %333 : vector<8x64xf32>
    %335 = math.exp %334 : vector<8x64xf32>
    %cst_50 = arith.constant 1.000000e+00 : f32
    %336 = vector.broadcast %cst_50 : f32 to vector<8x64xf32>
    %337 = arith.addf %336, %335 : vector<8x64xf32>
    %338 = arith.divf %336, %337 : vector<8x64xf32>
    %339 = vector.extract_strided_slice %338 {offsets = [0, 0], sizes = [8, 32], strides = [1, 1]} : vector<8x64xf32> to vector<8x32xf32>
    %340 = vector.extract_strided_slice %338 {offsets = [0, 32], sizes = [8, 32], strides = [1, 1]} : vector<8x64xf32> to vector<8x32xf32>
    %341 = vector.extract_strided_slice %329 {offsets = [0, 64], sizes = [8, 32], strides = [1, 1]} : vector<8x96xf32> to vector<8x32xf32>
    %342 = vector.extract_strided_slice %330 {offsets = [0, 64], sizes = [8, 32], strides = [1, 1]} : vector<8x96xf32> to vector<8x32xf32>
    %343 = arith.mulf %339, %342 : vector<8x32xf32>
    %344 = arith.addf %341, %343 : vector<8x32xf32>
    %345 = math.tanh %344 : vector<8x32xf32>
    %cst_51 = arith.constant 1.000000e+00 : f32
    %346 = vector.broadcast %cst_51 : f32 to vector<8x32xf32>
    %347 = arith.subf %346, %340 : vector<8x32xf32>
    %348 = arith.mulf %347, %345 : vector<8x32xf32>
    %349 = arith.mulf %340, %298 : vector<8x32xf32>
    %350 = arith.addf %348, %349 : vector<8x32xf32>
    %351 = arith.truncf %350 : vector<8x32xf32> to vector<8x32xbf16>
    %cst_52 = arith.constant dense<0.000000e+00> : vector<8x96xf32>
    %352 = tpu.matmul %351, %1, %cst_52 {dimension_numbers = #tpu.dot_dimension_numbers<[1], [0], [0], [1], [0, 0, 1, 1], [], []>} : vector<8x32xbf16>, vector<32x96xbf16>, vector<8x96xf32> -> vector<8x96xf32>
    %353 = vector.broadcast %5 : vector<1x96xf32> to vector<8x96xf32>
    %354 = arith.addf %352, %353 : vector<8x96xf32>
    %355 = vector.extract_strided_slice %328 {offsets = [0, 128], sizes = [8, 96], strides = [1, 1]} : vector<8x224xf32> to vector<8x96xf32>
    %356 = vector.extract_strided_slice %354 {offsets = [0, 0], sizes = [8, 64], strides = [1, 1]} : vector<8x96xf32> to vector<8x64xf32>
    %357 = vector.extract_strided_slice %355 {offsets = [0, 0], sizes = [8, 64], strides = [1, 1]} : vector<8x96xf32> to vector<8x64xf32>
    %358 = arith.addf %356, %357 : vector<8x64xf32>
    %359 = arith.negf %358 : vector<8x64xf32>
    %360 = math.exp %359 : vector<8x64xf32>
    %cst_53 = arith.constant 1.000000e+00 : f32
    %361 = vector.broadcast %cst_53 : f32 to vector<8x64xf32>
    %362 = arith.addf %361, %360 : vector<8x64xf32>
    %363 = arith.divf %361, %362 : vector<8x64xf32>
    %364 = vector.extract_strided_slice %363 {offsets = [0, 0], sizes = [8, 32], strides = [1, 1]} : vector<8x64xf32> to vector<8x32xf32>
    %365 = vector.extract_strided_slice %363 {offsets = [0, 32], sizes = [8, 32], strides = [1, 1]} : vector<8x64xf32> to vector<8x32xf32>
    %366 = vector.extract_strided_slice %354 {offsets = [0, 64], sizes = [8, 32], strides = [1, 1]} : vector<8x96xf32> to vector<8x32xf32>
    %367 = vector.extract_strided_slice %355 {offsets = [0, 64], sizes = [8, 32], strides = [1, 1]} : vector<8x96xf32> to vector<8x32xf32>
    %368 = arith.mulf %364, %367 : vector<8x32xf32>
    %369 = arith.addf %366, %368 : vector<8x32xf32>
    %370 = math.tanh %369 : vector<8x32xf32>
    %cst_54 = arith.constant 1.000000e+00 : f32
    %371 = vector.broadcast %cst_54 : f32 to vector<8x32xf32>
    %372 = arith.subf %371, %365 : vector<8x32xf32>
    %373 = arith.mulf %372, %370 : vector<8x32xf32>
    %374 = arith.mulf %365, %323 : vector<8x32xf32>
    %375 = arith.addf %373, %374 : vector<8x32xf32>
    %376 = tpu.concatenate %350, %375 in 1 : vector<8x32xf32>, vector<8x32xf32> -> vector<8x64xf32>
    %377 = arith.truncf %376 : vector<8x64xf32> to vector<8x64xbf16>
    %cst_55 = arith.constant dense<0.000000e+00> : vector<8x224xf32>
    %378 = tpu.matmul %377, %2, %cst_55 {dimension_numbers = #tpu.dot_dimension_numbers<[1], [0], [0], [1], [0, 0, 1, 1], [], []>} : vector<8x64xbf16>, vector<64x224xbf16>, vector<8x224xf32> -> vector<8x224xf32>
    %379 = vector.broadcast %3 : vector<1x224xf32> to vector<8x224xf32>
    %380 = arith.addf %378, %379 : vector<8x224xf32>
    %381 = vector.extract_strided_slice %9 {offsets = [56, 0], sizes = [8, 96], strides = [1, 1]} : vector<64x96xf32> to vector<8x96xf32>
    %382 = vector.extract_strided_slice %380 {offsets = [0, 0], sizes = [8, 96], strides = [1, 1]} : vector<8x224xf32> to vector<8x96xf32>
    %383 = vector.extract_strided_slice %381 {offsets = [0, 0], sizes = [8, 64], strides = [1, 1]} : vector<8x96xf32> to vector<8x64xf32>
    %384 = vector.extract_strided_slice %382 {offsets = [0, 0], sizes = [8, 64], strides = [1, 1]} : vector<8x96xf32> to vector<8x64xf32>
    %385 = arith.addf %383, %384 : vector<8x64xf32>
    %386 = arith.negf %385 : vector<8x64xf32>
    %387 = math.exp %386 : vector<8x64xf32>
    %cst_56 = arith.constant 1.000000e+00 : f32
    %388 = vector.broadcast %cst_56 : f32 to vector<8x64xf32>
    %389 = arith.addf %388, %387 : vector<8x64xf32>
    %390 = arith.divf %388, %389 : vector<8x64xf32>
    %391 = vector.extract_strided_slice %390 {offsets = [0, 0], sizes = [8, 32], strides = [1, 1]} : vector<8x64xf32> to vector<8x32xf32>
    %392 = vector.extract_strided_slice %390 {offsets = [0, 32], sizes = [8, 32], strides = [1, 1]} : vector<8x64xf32> to vector<8x32xf32>
    %393 = vector.extract_strided_slice %381 {offsets = [0, 64], sizes = [8, 32], strides = [1, 1]} : vector<8x96xf32> to vector<8x32xf32>
    %394 = vector.extract_strided_slice %382 {offsets = [0, 64], sizes = [8, 32], strides = [1, 1]} : vector<8x96xf32> to vector<8x32xf32>
    %395 = arith.mulf %391, %394 : vector<8x32xf32>
    %396 = arith.addf %393, %395 : vector<8x32xf32>
    %397 = math.tanh %396 : vector<8x32xf32>
    %cst_57 = arith.constant 1.000000e+00 : f32
    %398 = vector.broadcast %cst_57 : f32 to vector<8x32xf32>
    %399 = arith.subf %398, %392 : vector<8x32xf32>
    %400 = arith.mulf %399, %397 : vector<8x32xf32>
    %401 = arith.mulf %392, %350 : vector<8x32xf32>
    %402 = arith.addf %400, %401 : vector<8x32xf32>
    %403 = arith.truncf %402 : vector<8x32xf32> to vector<8x32xbf16>
    %cst_58 = arith.constant dense<0.000000e+00> : vector<8x96xf32>
    %404 = tpu.matmul %403, %1, %cst_58 {dimension_numbers = #tpu.dot_dimension_numbers<[1], [0], [0], [1], [0, 0, 1, 1], [], []>} : vector<8x32xbf16>, vector<32x96xbf16>, vector<8x96xf32> -> vector<8x96xf32>
    %405 = vector.broadcast %5 : vector<1x96xf32> to vector<8x96xf32>
    %406 = arith.addf %404, %405 : vector<8x96xf32>
    %407 = vector.extract_strided_slice %380 {offsets = [0, 128], sizes = [8, 96], strides = [1, 1]} : vector<8x224xf32> to vector<8x96xf32>
    %408 = vector.extract_strided_slice %406 {offsets = [0, 0], sizes = [8, 64], strides = [1, 1]} : vector<8x96xf32> to vector<8x64xf32>
    %409 = vector.extract_strided_slice %407 {offsets = [0, 0], sizes = [8, 64], strides = [1, 1]} : vector<8x96xf32> to vector<8x64xf32>
    %410 = arith.addf %408, %409 : vector<8x64xf32>
    %411 = arith.negf %410 : vector<8x64xf32>
    %412 = math.exp %411 : vector<8x64xf32>
    %cst_59 = arith.constant 1.000000e+00 : f32
    %413 = vector.broadcast %cst_59 : f32 to vector<8x64xf32>
    %414 = arith.addf %413, %412 : vector<8x64xf32>
    %415 = arith.divf %413, %414 : vector<8x64xf32>
    %416 = vector.extract_strided_slice %415 {offsets = [0, 0], sizes = [8, 32], strides = [1, 1]} : vector<8x64xf32> to vector<8x32xf32>
    %417 = vector.extract_strided_slice %415 {offsets = [0, 32], sizes = [8, 32], strides = [1, 1]} : vector<8x64xf32> to vector<8x32xf32>
    %418 = vector.extract_strided_slice %406 {offsets = [0, 64], sizes = [8, 32], strides = [1, 1]} : vector<8x96xf32> to vector<8x32xf32>
    %419 = vector.extract_strided_slice %407 {offsets = [0, 64], sizes = [8, 32], strides = [1, 1]} : vector<8x96xf32> to vector<8x32xf32>
    %420 = arith.mulf %416, %419 : vector<8x32xf32>
    %421 = arith.addf %418, %420 : vector<8x32xf32>
    %422 = math.tanh %421 : vector<8x32xf32>
    %cst_60 = arith.constant 1.000000e+00 : f32
    %423 = vector.broadcast %cst_60 : f32 to vector<8x32xf32>
    %424 = arith.subf %423, %417 : vector<8x32xf32>
    %425 = arith.mulf %424, %422 : vector<8x32xf32>
    %426 = arith.mulf %417, %375 : vector<8x32xf32>
    %427 = arith.addf %425, %426 : vector<8x32xf32>
    %c0_61 = arith.constant 0 : index
    %c0_62 = arith.constant 0 : index
    %428 = vector.load %arg4[%c0_61, %c0_62] : memref<48x258xbf16, #tpu.memory_space<vmem>>, vector<48x32xbf16>
    %c0_63 = arith.constant 0 : index
    %c128_64 = arith.constant 128 : index
    %429 = vector.load %arg4[%c0_63, %c128_64] : memref<48x258xbf16, #tpu.memory_space<vmem>>, vector<32x16xbf16>
    %c0_65 = arith.constant 0 : index
    %c256_66 = arith.constant 256 : index
    %430 = vector.load %arg4[%c0_65, %c256_66] : memref<48x258xbf16, #tpu.memory_space<vmem>>, vector<16x2xbf16>
    %c0_67 = arith.constant 0 : index
    %c0_68 = arith.constant 0 : index
    %431 = vector.load %arg5[%c0_67, %c0_68] : memref<1x258xf32, #tpu.memory_space<vmem>>, vector<1x32xf32>
    %c0_69 = arith.constant 0 : index
    %c128_70 = arith.constant 128 : index
    %432 = vector.load %arg5[%c0_69, %c128_70] : memref<1x258xf32, #tpu.memory_space<vmem>>, vector<1x16xf32>
    %c0_71 = arith.constant 0 : index
    %c256_72 = arith.constant 256 : index
    %433 = vector.load %arg5[%c0_71, %c256_72] : memref<1x258xf32, #tpu.memory_space<vmem>>, vector<1x2xf32>
    %c0_73 = arith.constant 0 : index
    %c0_74 = arith.constant 0 : index
    %434 = vector.load %arg1[%c0_73, %c0_74] : memref<8x16xf32, #tpu.memory_space<vmem>>, vector<8x16xf32>
    %435 = tpu.concatenate %434, %427 in 1 : vector<8x16xf32>, vector<8x32xf32> -> vector<8x48xf32>
    %436 = arith.truncf %435 : vector<8x48xf32> to vector<8x48xbf16>
    %cst_75 = arith.constant dense<0.000000e+00> : vector<8x32xf32>
    %437 = tpu.matmul %436, %428, %cst_75 {dimension_numbers = #tpu.dot_dimension_numbers<[1], [0], [0], [1], [0, 0, 1, 1], [], []>} : vector<8x48xbf16>, vector<48x32xbf16>, vector<8x32xf32> -> vector<8x32xf32>
    %438 = vector.broadcast %431 : vector<1x32xf32> to vector<8x32xf32>
    %439 = arith.addf %437, %438 : vector<8x32xf32>
    %cst_76 = arith.constant 0.000000e+00 : f32
    %440 = vector.broadcast %cst_76 : f32 to vector<8x32xf32>
    %441 = arith.maximumf %439, %440 : vector<8x32xf32>
    %442 = arith.truncf %441 : vector<8x32xf32> to vector<8x32xbf16>
    %cst_77 = arith.constant dense<0.000000e+00> : vector<8x16xf32>
    %443 = tpu.matmul %442, %429, %cst_77 {dimension_numbers = #tpu.dot_dimension_numbers<[1], [0], [0], [1], [0, 0, 1, 1], [], []>} : vector<8x32xbf16>, vector<32x16xbf16>, vector<8x16xf32> -> vector<8x16xf32>
    %444 = vector.broadcast %432 : vector<1x16xf32> to vector<8x16xf32>
    %445 = arith.addf %443, %444 : vector<8x16xf32>
    %cst_78 = arith.constant 0.000000e+00 : f32
    %446 = vector.broadcast %cst_78 : f32 to vector<8x16xf32>
    %447 = arith.maximumf %445, %446 : vector<8x16xf32>
    %448 = arith.truncf %447 : vector<8x16xf32> to vector<8x16xbf16>
    %cst_79 = arith.constant dense<0.000000e+00> : vector<8x2xf32>
    %449 = tpu.matmul %448, %430, %cst_79 {dimension_numbers = #tpu.dot_dimension_numbers<[1], [0], [0], [1], [0, 0, 1, 1], [], []>} : vector<8x16xbf16>, vector<16x2xbf16>, vector<8x2xf32> -> vector<8x2xf32>
    %450 = vector.broadcast %433 : vector<1x2xf32> to vector<8x2xf32>
    %451 = arith.addf %449, %450 : vector<8x2xf32>
    %cst_80 = arith.constant dense<0xFF800000> : vector<8xf32>
    %452 = vector.multi_reduction <maximumf>, %451, %cst_80 [1] : vector<8x2xf32> to vector<8xf32>
    %453 = vector.shape_cast %452 : vector<8xf32> to vector<8x1xf32>
    %454 = vector.broadcast %453 : vector<8x1xf32> to vector<8x2xf32>
    %455 = arith.subf %451, %454 : vector<8x2xf32>
    %456 = math.exp %455 : vector<8x2xf32>
    %cst_81 = arith.constant dense<0.000000e+00> : vector<8xf32>
    %457 = vector.multi_reduction <add>, %456, %cst_81 [1] : vector<8x2xf32> to vector<8xf32>
    %458 = vector.shape_cast %457 : vector<8xf32> to vector<8x1xf32>
    %459 = math.log %458 : vector<8x1xf32>
    %460 = vector.broadcast %459 : vector<8x1xf32> to vector<8x2xf32>
    %461 = arith.subf %455, %460 : vector<8x2xf32>
    %c0_82 = arith.constant 0 : index
    %c0_83 = arith.constant 0 : index
    %462 = vector.load %arg6[%c0_82, %c0_83] : memref<8x2xf32, #tpu.memory_space<vmem>>, vector<8x2xf32>
    tpu.vector_store %arg6[%c0_82, %c0_83], %461 {strides = array<i32>} : memref<8x2xf32, #tpu.memory_space<vmem>>, vector<8x2xf32>,
    return
  }
}

</mosaic_0001>

<bundles_post_ra>
// kernel: inclusive_forward.1
= control target key start
LH: loop header
LB: loop body
LE: loop exit
PB: predicated region body
PF: predicated region fallthrough
CT: control target
= control target key end

     0   :  { %11 = vsyncpa [#allocation3], 0  ;;  %s2020_s21 = smov [#allocation2]   ;;  %s2528_s0 = inlined_call_operand.vmem [shape: bf16[64,8], index: 0, kind: input, shape index: {}]   ;;  %s2529_s1 = inlined_call_operand.vmem [shape: f32[8,16], index: 1, kind: input, shape index: {}]   ;;  %s2530_s2 = inlined_call_operand.vmem [shape: bf16[64,480], index: 2, kind: input, shape index: {}]   ;;  %s2531_s3 = inlined_call_operand.vmem [shape: f32[1,480], index: 3, kind: input, shape index: {}]   ;;  %s2532_s4 = inlined_call_operand.hbm [shape: bf16[48,258], index: 4, kind: input, shape index: {}]   ;;  %s2533_s5 = inlined_call_operand.vmem [shape: f32[1,258], index: 5, kind: input, shape index: {}]   ;;  %s2534_s6 = inlined_call_operand.vmem [shape: f32[8,2], index: 6, kind: output, shape index: {}]  }
   0x1   :  { %s25_s22 = sshll.u32 %s2020_s21, 4  ;;  %s26_s22 = int_to_ptr.vmem [resolvable:$true] %s25_s22 }
   0x2   :  { %s2006_s23 = scalar_lea.vmem %s26_s22, 1152  ;;  %p2011_p1 = scmp.lt.s32.totalorder %s26_s22, %s26_s22 }
   0x3   :  { %p2007_p0 = scmp.ne.s32.totalorder %s26_s22, %s2006_s23  ;;  %p2012_p2 = scmp.lt.s32.totalorder %s2006_s23, %s2006_s23 }
   0x5   :  { %p2013_p3 = por %p2012_p2, %p2011_p1 }
   0x7   :  { %p2014_p4 = pnand %p2013_p3, %p2007_p0 }
   0x9   :  { %2017 = shalt.err (!%p2014_p4)
}
   0xa   :  { %s2021_s24 = smov 192   ;;  %s2022_s25 = smov 12  }
   0xb   :  { %31 = dma.hbm_to_vmem [thread:$0]  %s2532_s4, 1152, %s26_s22, [#allocation3], %s2021_s24, %s2021_s24, %s2022_s25  }
   0xc   :  { %2018 = dma.done.wait [#allocation3], 1152  }
   0xd   :  { %2019 = vsyncadd [#allocation3], 4294966144  ;;  %vm101_vm0 = vcmask 1043456   ;;  %vm88_vm1 = vcmask 64512   ;;  %v38_v0 = vld [vmem:[%s2530_s2] sm:$0xf]  ;;  %v171_v15 = vlaneseq }
   0xe   :  { %1856 = vmatprep.subr.msk.bf16.mxu1 %vm101_vm0, %v38_v0  ;;  %v103_v1 = vsel %vm101_vm0, %v38_v0, 0  ;;  %v1866_v2 = vld [vmem:[%s2528_s0] sm:$0xff]   ;;  %v1867_v3 = vld [vmem:[%s2528_s0 + $0x8] sm:$0xff]   ;;  %v1874_v7 = vld [vmem:[%s2528_s0 + $0x10] sm:$0xff]   ;;  %v2023_v14 = vmov 0   ;;  %s2024_s8 = smov 64  }
   0xf   :  { %1759 = vmatpush3.bf16.msra.mxu1 %v103_v1  ;;  %1760 = vmatprep.mubr.msk.bf16.mxu1 %vm88_vm1, %v1866_v2  ;;  %v2080_v4 = vld [vmem:[%s2530_s2 + $0x6c] ss:$16 sps:$4 sm:$0xff]   ;;  %v2085_v5 = vld [vmem:[%s2530_s2 + $0x68] ss:$16 sps:$4 sm:$0xff]   ;;  %v172_v16 = vshrl.u32 %v171_v15, 7  ;;  %v2025_v55 = vmov 0.0  }
  0x10   :  { %v2090_v6 = vld [vmem:[%s2530_s2 + $0x4c] ss:$16 sps:$4 sm:$0xff]   ;;  %233 = vmatprep.subr.bf16.mxu1 %v2080_v4  ;;  %v2101_v8 = vld [vmem:[%s2530_s2 + $0x48] ss:$16 sps:$4 sm:$0xff]   ;;  %v51_v18 = vld [vmem:[%s2531_s3] sm:$0x3]  ;;  %1768 = vmatprep.subr.bf16.mxu0 %v2025_v55 }
  0x11   :  { %v2108_v9 = vld [vmem:[%s2530_s2 + $0x2c] ss:$16 sps:$4 sm:$0xff]   ;;  %v2116_v11 = vld [vmem:[%s2530_s2 + $0x28] ss:$16 sps:$4 sm:$0xff]   ;;  %v177_v17 = vsub.s32 1, %v172_v16  ;;  %v173_v30 = vsub.s32 0, %v172_v16 }
  0x12   :  { %1761 = vmatmul.mubr.msk.bf16.vlgmr.msra.gmra.mxu1 %vm88_vm1, %v1867_v3  ;;  %v1875_v10 = vld [vmem:[%s2528_s0 + $0x18] sm:$0xff]   ;;  %v1657_v20 = vld [vmem:[%s2531_s3 + $0x2] ss:$0 sm:$0xff]  ;;  %v2177_v54 = vld [vmem:[%s2530_s2 + $0x24] ss:$16 sps:$4 sm:$0xff]   ;;  %vm2026_vm2 = vmmov 0  }
  0x13   :  { %234 = vmatpush1.bf16.msra.mxu1 %v2085_v5  ;;  %1764 = vmatprep.mubr.msk.bf16.mxu1 %vm88_vm1, %v1874_v7  ;;  %v2121_v12 = vld [vmem:[%s2530_s2 + $0xc] ss:$16 sps:$4 sm:$0xff]   ;;  %v2128_v13 = vld [vmem:[%s2530_s2 + $0x8] ss:$16 sps:$4 sm:$0xff]   ;;  %v2148_v19 = vrot.slane %v51_v18, %v177_v17  ;;  %v2165_v35 = vrot.slane %v51_v18, %v173_v30  ;;  %v2186_v56 = vld [vmem:[%s2530_s2 + $0x4] ss:$16 sps:$4 sm:$0xff]  }
  0x14   :  { %235 = vmatprep.subr.bf16.mxu1 %v2090_v6  ;;  %1772 = vmatprep.mubr.msk.bf16.mxu0 %vm2026_vm2, %v2025_v55  ;;  %s2027_s12 = smov 96   ;;  %vm314_vm3 = vcmask 261120   ;;  %v2208_v1 = vld [vmem:[%s2531_s3 + $0x3] ss:$0 sm:$0xff]  ;;  %vm221_vm4 = vcmask 523264   ;;  %vm1447_vm5 = vcmask 130048  }
  0x15   :  { %1769 = vmatpush3.bf16.msra.mxu0 %v2177_v54  ;;  %vm1474_vm6 = vcmask 392192   ;;  %vm1638_vm7 = vcmask 15360  }
  0x16   :  { %1770 = vmatprep.subr.bf16.mxu0 %v2025_v55 }
  0x17   :  { %236 = vmatpush1.bf16.msra.mxu1 %v2101_v8 }
  0x18   :  { %237 = vmatprep.subr.bf16.mxu1 %v2108_v9 }
  0x19   :  { %1771 = vmatpush3.bf16.msra.mxu0 %v2186_v56 }
  0x1a   :  { %1765 = vmatmul.mubr.msk.bf16.gmra.mxu1 %vm88_vm1, %v1875_v10  ;;  %1776 = vmatprep.subr.bf16.mxu0 %v2025_v55 }
  0x1b   :  { %238 = vmatpush1.bf16.msra.mxu1 %v2116_v11  ;;  %257 = vmatprep.mubr.bf16.mxu1 %v2023_v14 }
  0x1c   :  { %239 = vmatprep.subr.bf16.mxu1 %v2121_v12 }
  0x1f   :  { %240 = vmatpush1.bf16.msra.mxu1 %v2128_v13 }
  0x20   :  { %401 = vmatprep.subr.bf16.mxu1 %v2080_v4 }
  0x22   :  { %258 = vmatmul.mubr.bf16.vlgmr.msra.gmra.mxu1 %v2023_v14 }
  0x23   :  { %402 = vmatpush1.bf16.msra.mxu1 %v2085_v5  ;;  %425 = vmatprep.mubr.bf16.mxu1 %v2023_v14 }
  0x24   :  { %403 = vmatprep.subr.bf16.mxu1 %v2090_v6 }
  0x27   :  { %404 = vmatpush1.bf16.msra.mxu1 %v2101_v8 }
  0x28   :  { %405 = vmatprep.subr.bf16.mxu1 %v2108_v9 }
  0x2b   :  { %406 = vmatpush1.bf16.msra.mxu1 %v2116_v11 }
  0x2c   :  { %407 = vmatprep.subr.bf16.mxu1 %v2121_v12 }
  0x2f   :  { %408 = vmatpush1.bf16.msra.mxu1 %v2128_v13 }
  0x30   :  { %1784 = vmatprep.subr.bf16.mxu1 %v2025_v55 }
  0xd2   :  { %v1762_v21 = vpop.f32.mrf.mxu1 }
  0xd3   :  { %v2153_v22 = vadd.f32 %v1762_v21, %v1657_v20 }
  0xd4   :  { %v139_v23 = vpop.f32.mrf.mxu1 }
  0xd5   :  { %v140_v43 = vadd.f32 %v1657_v20, %v139_v23 }
  0xd6   :  { %v1763_v24 = vpop.f32.mrf.mxu1 }
  0xd7   :  { %v2155_v25 = vadd.f32 %v1763_v24, %v1657_v20 }
  0xd8   :  { %v142_v26 = vpop.f32.mrf.mxu1 }
  0xd9   :  { %v2157_v27 = vadd.f32 %v1657_v20, %v142_v26 }
  0xda   :  { %v1766_v28 = vpop.f32.mrf.mxu1 }
  0xdb   :  { %v2159_v29 = vadd.f32 %v1766_v28, %v1657_v20 }
  0xdc   :  { %v155_v31 = vpop.f32.mrf.mxu1 }
  0xdd   :  { %v2161_v32 = vadd.f32 %v1657_v20, %v155_v31 }
  0xde   :  { %v1767_v33 = vpop.f32.mrf.mxu1 }
  0xdf   :  { %v2163_v34 = vadd.f32 %v1767_v33, %v1657_v20 }
  0xe0   :  { %v158_v36 = vpop.f32.mrf.mxu1 }
  0xe1   :  { %v2167_v37 = vadd.f32 %v1657_v20, %v158_v36 }
  0xe2   :  { %v259_v38 = vpop.f32.mrf.mxu1 }
  0xe3   :  { %v260_v39 = vadd.f32 %v259_v38, %v2165_v35 }
  0xe4   :  { %v261_v40 = vpop.f32.mrf.mxu1 }
  0xe5   :  { %274 = vrot.lane.b32.xlu0 %v260_v39, %s2024_s8  ;;  %v266_v44 = vadd.f32 %v260_v39, %v140_v43  ;;  %v262_v51 = vadd.f32 %v261_v40, %v2148_v19 }
  0xe6   :  { %v263_v41 = vpop.f32.mrf.mxu1 }
  0xe7   :  { %v1674_v45 = vmul.f32 -1.442695, %v266_v44 }
  0xe8   :  { %v264_v42 = vpop.f32.mrf.mxu1 }
  0xe9   :  { %1890 = vpow2.f32 %v1674_v45 }
  0xf6   :  { %v1891_v46 = vpop.eup %1890 }
  0xf7   :  { %v270_v47 = vadd.f32 1.0, %v1891_v46 }
  0xf9   :  { %1892 = vrcp.f32 %v270_v47 }
 0x106   :  { %v1893_v48 = vpop.eup %1892 }
 0x107   :  { %v284_v58 = vsub.f32 1.0, %v1893_v48  ;;  %v290_v60 = vmul.f32 0.0, %v1893_v48 }
 0x157   :  { %v275_v49 = vpop.permute.xlu0 %274 }
 0x158   :  { %v277_v50 = vmul.f32 %v1893_v48, %v275_v49 }
 0x15a   :  { %279 = vrot.lane.b32.xlu0 %v277_v50, %s2024_s8 }
 0x15e   :  { %366 = vrot.lane.b32.xlu0 %v262_v51, %s2024_s8 }
 0x1cc   :  { %v280_v52 = vpop.permute.xlu0 %279 }
 0x1cd   :  { %v282_v53 = vadd.f32 %v280_v52, %v140_v43 }
 0x1cf   :  { %1894 = vtanh.f32 %v282_v53 }
 0x1d0   :  { %v367_v23 = vpop.permute.xlu0 %366 }
 0x1dc   :  { %v1895_v57 = vpop.eup %1894 }
 0x1dd   :  { %286 = vrot.lane.b32.xlu1 %v1895_v57, %s2027_s12 }
 0x24f   :  { %v287_v59 = vpop.permute.xlu1 %286 }
 0x250   :  { %v289_v61 = vmul.f32 %v287_v59, %v284_v58 }
 0x252   :  { %v2193_v62 = vadd.f32 %v290_v60, %v289_v61 }
 0x254   :  { %v292_v63 = vpack.c.bf16 %v2193_v62, %v2193_v62 }
 0x256   :  { %300 = vrot.lane.b32.xlu1 %v292_v63, %s2027_s12 }
 0x2c8   :  { %v301_v0 = vpop.permute.xlu1 %300 }
 0x2c9   :  { %1773 = vmatmul.mubr.msk.bf16.vlgmr.msra.gmra.mxu0 %vm314_vm3, %v301_v0 }
 0x2ca   :  { %1777 = vmatpush3.bf16.msra.mxu0 %v2177_v54  ;;  %1780 = vmatprep.mubr.msk.bf16.mxu0 %vm2026_vm2, %v2025_v55 }
 0x2cb   :  { %1778 = vmatprep.subr.bf16.mxu0 %v2025_v55 }
 0x2ce   :  { %1779 = vmatpush3.bf16.msra.mxu0 %v2186_v56 }
 0x2cf   :  { %550 = vmatprep.subr.bf16.mxu0 %v2080_v4 }
 0x389   :  { %v352_v2 = vpop.f32.mrf.mxu0 }
 0x38a   :  { %v353_v3 = vadd.f32 %v2208_v1, %v352_v2 }
 0x38b   :  { %v1774_v7 = vpop.f32.mrf.mxu0 }
 0x38c   :  { %v358_v10 = vadd.f32 %v353_v3, %v262_v51 }
 0x38d   :  { %v355_v15 = vpop.f32.mrf.mxu0 }
 0x38e   :  { %v1679_v16 = vmul.f32 -1.442695, %v358_v10 }
 0x38f   :  { %v1775_v17 = vpop.f32.mrf.mxu0 }
 0x390   :  { %1896 = vpow2.f32 %v1679_v16 }
 0x39d   :  { %v1897_v18 = vpop.eup %1896 }
 0x39e   :  { %v362_v20 = vadd.f32 1.0, %v1897_v18 }
 0x3a0   :  { %1898 = vrcp.f32 %v362_v20 }
 0x3ad   :  { %v1899_v21 = vpop.eup %1898 }
 0x3ae   :  { %v369_v24 = vmul.f32 %v1899_v21, %v367_v23  ;;  %v376_v31 = vsub.f32 1.0, %v1899_v21  ;;  %v382_v36 = vmul.f32 0.0, %v1899_v21 }
 0x3b0   :  { %371 = vrot.lane.b32.xlu1 %v369_v24, %s2024_s8 }
 0x3b4   :  { %385 = vrot.lane.b32.xlu1 %v2193_v62, %s2027_s12 }
 0x422   :  { %v372_v26 = vpop.permute.xlu1 %371 }
 0x423   :  { %v374_v28 = vadd.f32 %v372_v26, %v353_v3 }
 0x425   :  { %1900 = vtanh.f32 %v374_v28 }
 0x426   :  { %v386_v40 = vpop.permute.xlu1 %385 }
 0x432   :  { %v1901_v30 = vpop.eup %1900 }
 0x433   :  { %378 = vrot.lane.b32.xlu0 %v1901_v30, %s2027_s12 }
 0x4a5   :  { %v379_v33 = vpop.permute.xlu0 %378 }
 0x4a6   :  { %v381_v38 = vmul.f32 %v379_v33, %v376_v31 }
 0x4a8   :  { %v2215_v39 = vadd.f32 %v382_v36, %v381_v38 }
 0x4aa   :  { %v388_v41 = vsel %vm314_vm3, %v386_v40, %v2215_v39 }
 0x4ab   :  { %v389_v42 = vpack.c.bf16 %v388_v41, %v388_v41 }
 0x4ad   :  { %1680 = vmatmul.mubr.msk.bf16.vlgmr.msra.gmra.mxu1 %vm221_vm4, %v389_v42 }
 0x4ae   :  { %1785 = vmatpush3.bf16.msra.mxu1 %v2177_v54  ;;  %1788 = vmatprep.mubr.msk.bf16.mxu1 %vm2026_vm2, %v2025_v55 }
 0x4af   :  { %1786 = vmatprep.subr.bf16.mxu1 %v2025_v55 }
 0x4b2   :  { %1787 = vmatpush3.bf16.msra.mxu1 %v2186_v56 }
 0x4b3   :  { %699 = vmatprep.subr.bf16.mxu1 %v2080_v4 }
 0x56d   :  { %v427_v43 = vpop.f32.mrf.mxu1 }
 0x56e   :  { %v428_v44 = vadd.f32 %v427_v43, %v2165_v35 }
 0x56f   :  { %v429_v45 = vpop.f32.mrf.mxu1 }
 0x570   :  { %442 = vrot.lane.b32.xlu0 %v428_v44, %s2024_s8  ;;  %v434_v48 = vadd.f32 %v428_v44, %v2157_v27  ;;  %v430_v61 = vadd.f32 %v429_v45, %v2148_v19 }
 0x571   :  { %v431_v46 = vpop.f32.mrf.mxu1 }
 0x572   :  { %v1681_v49 = vmul.f32 -1.442695, %v434_v48 }
 0x573   :  { %v432_v47 = vpop.f32.mrf.mxu1 }
 0x574   :  { %1902 = vpow2.f32 %v1681_v49 }
 0x581   :  { %v1903_v50 = vpop.eup %1902 }
 0x582   :  { %v438_v51 = vadd.f32 1.0, %v1903_v50 }
 0x584   :  { %1904 = vrcp.f32 %v438_v51 }
 0x591   :  { %v1905_v52 = vpop.eup %1904 }
 0x592   :  { %v452_v63 = vsub.f32 1.0, %v1905_v52  ;;  %v458_v2 = vmul.f32 %v1905_v52, %v2193_v62 }
 0x5e2   :  { %v443_v53 = vpop.permute.xlu0 %442 }
 0x5e3   :  { %v445_v57 = vmul.f32 %v1905_v52, %v443_v53 }
 0x5e5   :  { %447 = vrot.lane.b32.xlu1 %v445_v57, %s2024_s8 }
 0x657   :  { %v448_v58 = vpop.permute.xlu1 %447 }
 0x658   :  { %v450_v59 = vadd.f32 %v448_v58, %v2157_v27 }
 0x65a   :  { %1906 = vtanh.f32 %v450_v59 }
 0x667   :  { %v1907_v60 = vpop.eup %1906 }
 0x668   :  { %454 = vrot.lane.b32.xlu0 %v1907_v60, %s2027_s12 }
 0x66c   :  { %515 = vrot.lane.b32.xlu0 %v430_v61, %s2024_s8 }
 0x6da   :  { %v455_v0 = vpop.permute.xlu0 %454 }
 0x6db   :  { %v457_v3 = vmul.f32 %v455_v0, %v452_v63 }
 0x6dd   :  { %v2235_v7 = vadd.f32 %v458_v2, %v457_v3 }
 0x6de   :  { %v516_v28 = vpop.permute.xlu0 %515 }
 0x6df   :  { %v460_v10 = vpack.c.bf16 %v2235_v7, %v2235_v7 }
 0x6e1   :  { %462 = vrot.lane.b32.xlu1 %v460_v10, %s2027_s12 }
 0x753   :  { %v463_v27 = vpop.permute.xlu1 %462 }
 0x754   :  { %1781 = vmatmul.mubr.msk.bf16.vlgmr.msra.gmra.mxu0 %vm314_vm3, %v463_v27 }
 0x755   :  { %551 = vmatpush1.bf16.msra.mxu0 %v2085_v5  ;;  %574 = vmatprep.mubr.bf16.mxu0 %v2023_v14 }
 0x756   :  { %552 = vmatprep.subr.bf16.mxu0 %v2090_v6 }
 0x759   :  { %553 = vmatpush1.bf16.msra.mxu0 %v2101_v8 }
 0x75a   :  { %554 = vmatprep.subr.bf16.mxu0 %v2108_v9 }
 0x75d   :  { %555 = vmatpush1.bf16.msra.mxu0 %v2116_v11 }
 0x75e   :  { %556 = vmatprep.subr.bf16.mxu0 %v2121_v12 }
 0x761   :  { %557 = vmatpush1.bf16.msra.mxu0 %v2128_v13 }
 0x762   :  { %1792 = vmatprep.subr.bf16.mxu0 %v2025_v55 }
 0x814   :  { %v501_v62 = vpop.f32.mrf.mxu0 }
 0x815   :  { %v502_v15 = vadd.f32 %v2208_v1, %v501_v62 }
 0x816   :  { %v1782_v16 = vpop.f32.mrf.mxu0 }
 0x817   :  { %v507_v17 = vadd.f32 %v502_v15, %v430_v61 }
 0x818   :  { %v504_v18 = vpop.f32.mrf.mxu0 }
 0x819   :  { %v1683_v20 = vmul.f32 -1.442695, %v507_v17 }
 0x81a   :  { %v1783_v21 = vpop.f32.mrf.mxu0 }
 0x81b   :  { %1908 = vpow2.f32 %v1683_v20 }
 0x828   :  { %v1909_v23 = vpop.eup %1908 }
 0x829   :  { %v511_v24 = vadd.f32 1.0, %v1909_v23 }
 0x82b   :  { %1910 = vrcp.f32 %v511_v24 }
 0x838   :  { %v1911_v26 = vpop.eup %1910 }
 0x839   :  { %v518_v30 = vmul.f32 %v1911_v26, %v516_v28  ;;  %v525_v38 = vsub.f32 1.0, %v1911_v26  ;;  %v531_v41 = vmul.f32 %v1911_v26, %v2215_v39 }
 0x83b   :  { %520 = vrot.lane.b32.xlu1 %v518_v30, %s2024_s8 }
 0x83f   :  { %534 = vrot.lane.b32.xlu1 %v2235_v7, %s2027_s12 }
 0x8ad   :  { %v521_v31 = vpop.permute.xlu1 %520 }
 0x8ae   :  { %v523_v33 = vadd.f32 %v521_v31, %v502_v15 }
 0x8b0   :  { %1912 = vtanh.f32 %v523_v33 }
 0x8b1   :  { %v535_v44 = vpop.permute.xlu1 %534 }
 0x8bd   :  { %v1913_v36 = vpop.eup %1912 }
 0x8be   :  { %527 = vrot.lane.b32.xlu0 %v1913_v36, %s2027_s12 }
 0x930   :  { %v528_v40 = vpop.permute.xlu0 %527 }
 0x931   :  { %v530_v42 = vmul.f32 %v528_v40, %v525_v38 }
 0x933   :  { %v2256_v43 = vadd.f32 %v531_v41, %v530_v42 }
 0x935   :  { %v537_v45 = vsel %vm314_vm3, %v535_v44, %v2256_v43 }
 0x936   :  { %v538_v46 = vpack.c.bf16 %v537_v45, %v537_v45 }
 0x938   :  { %1684 = vmatmul.mubr.msk.bf16.vlgmr.msra.gmra.mxu0 %vm221_vm4, %v538_v46 }
 0x939   :  { %1793 = vmatpush3.bf16.msra.mxu0 %v2177_v54  ;;  %1796 = vmatprep.mubr.msk.bf16.mxu0 %vm2026_vm2, %v2025_v55 }
 0x93a   :  { %1794 = vmatprep.subr.bf16.mxu0 %v2025_v55 }
 0x93d   :  { %1795 = vmatpush3.bf16.msra.mxu0 %v2186_v56 }
 0x93e   :  { %848 = vmatprep.subr.bf16.mxu0 %v2080_v4 }
 0x9f8   :  { %v576_v39 = vpop.f32.mrf.mxu0 }
 0x9f9   :  { %v577_v47 = vadd.f32 %v576_v39, %v2165_v35 }
 0x9fa   :  { %v578_v48 = vpop.f32.mrf.mxu0 }
 0x9fb   :  { %591 = vrot.lane.b32.xlu0 %v577_v47, %s2024_s8  ;;  %v583_v51 = vadd.f32 %v577_v47, %v2153_v22  ;;  %v579_v2 = vadd.f32 %v578_v48, %v2148_v19 }
 0x9fc   :  { %v580_v49 = vpop.f32.mrf.mxu0 }
 0x9fd   :  { %v1685_v52 = vmul.f32 -1.442695, %v583_v51 }
 0x9fe   :  { %v581_v50 = vpop.f32.mrf.mxu0 }
 0x9ff   :  { %1914 = vpow2.f32 %v1685_v52 }
 0xa0c   :  { %v1915_v53 = vpop.eup %1914 }
 0xa0d   :  { %v587_v57 = vadd.f32 1.0, %v1915_v53 }
 0xa0f   :  { %1916 = vrcp.f32 %v587_v57 }
 0xa1c   :  { %v1917_v58 = vpop.eup %1916 }
 0xa1d   :  { %v601_v3 = vsub.f32 1.0, %v1917_v58  ;;  %v607_v27 = vmul.f32 %v1917_v58, %v2235_v7 }
 0xa6d   :  { %v592_v59 = vpop.permute.xlu0 %591 }
 0xa6e   :  { %v594_v60 = vmul.f32 %v1917_v58, %v592_v59 }
 0xa70   :  { %596 = vrot.lane.b32.xlu1 %v594_v60, %s2024_s8 }
 0xae2   :  { %v597_v61 = vpop.permute.xlu1 %596 }
 0xae3   :  { %v599_v63 = vadd.f32 %v597_v61, %v2153_v22 }
 0xae5   :  { %1918 = vtanh.f32 %v599_v63 }
 0xaf2   :  { %v1919_v0 = vpop.eup %1918 }
 0xaf3   :  { %603 = vrot.lane.b32.xlu0 %v1919_v0, %s2027_s12 }
 0xaf7   :  { %664 = vrot.lane.b32.xlu0 %v579_v2, %s2024_s8 }
 0xb65   :  { %v604_v10 = vpop.permute.xlu0 %603 }
 0xb66   :  { %v606_v62 = vmul.f32 %v604_v10, %v601_v3 }
 0xb68   :  { %v2276_v15 = vadd.f32 %v607_v27, %v606_v62 }
 0xb69   :  { %v665_v31 = vpop.permute.xlu0 %664 }
 0xb6a   :  { %v609_v16 = vpack.c.bf16 %v2276_v15, %v2276_v15 }
 0xb6c   :  { %611 = vrot.lane.b32.xlu1 %v609_v16, %s2027_s12 }
 0xbde   :  { %v612_v22 = vpop.permute.xlu1 %611 }
 0xbdf   :  { %1789 = vmatmul.mubr.msk.bf16.vlgmr.msra.gmra.mxu1 %vm314_vm3, %v612_v22 }
 0xbe0   :  { %700 = vmatpush1.bf16.msra.mxu1 %v2085_v5  ;;  %723 = vmatprep.mubr.bf16.mxu1 %v2023_v14 }
 0xbe1   :  { %701 = vmatprep.subr.bf16.mxu1 %v2090_v6 }
 0xbe4   :  { %702 = vmatpush1.bf16.msra.mxu1 %v2101_v8 }
 0xbe5   :  { %703 = vmatprep.subr.bf16.mxu1 %v2108_v9 }
 0xbe8   :  { %704 = vmatpush1.bf16.msra.mxu1 %v2116_v11 }
 0xbe9   :  { %705 = vmatprep.subr.bf16.mxu1 %v2121_v12 }
 0xbec   :  { %706 = vmatpush1.bf16.msra.mxu1 %v2128_v13 }
 0xbed   :  { %1800 = vmatprep.subr.bf16.mxu1 %v2025_v55 }
 0xc9f   :  { %v650_v7 = vpop.f32.mrf.mxu1 }
 0xca0   :  { %v651_v17 = vadd.f32 %v2208_v1, %v650_v7 }
 0xca1   :  { %v1790_v18 = vpop.f32.mrf.mxu1 }
 0xca2   :  { %v656_v20 = vadd.f32 %v651_v17, %v579_v2 }
 0xca3   :  { %v653_v21 = vpop.f32.mrf.mxu1 }
 0xca4   :  { %v1687_v23 = vmul.f32 -1.442695, %v656_v20 }
 0xca5   :  { %v1791_v24 = vpop.f32.mrf.mxu1 }
 0xca6   :  { %1920 = vpow2.f32 %v1687_v23 }
 0xcb3   :  { %v1921_v26 = vpop.eup %1920 }
 0xcb4   :  { %v660_v28 = vadd.f32 1.0, %v1921_v26 }
 0xcb6   :  { %1922 = vrcp.f32 %v660_v28 }
 0xcc3   :  { %v1923_v30 = vpop.eup %1922 }
 0xcc4   :  { %v667_v33 = vmul.f32 %v1923_v30, %v665_v31  ;;  %v674_v41 = vsub.f32 1.0, %v1923_v30  ;;  %v680_v44 = vmul.f32 %v1923_v30, %v2256_v43 }
 0xcc6   :  { %669 = vrot.lane.b32.xlu1 %v667_v33, %s2024_s8 }
 0xcca   :  { %683 = vrot.lane.b32.xlu1 %v2276_v15, %s2027_s12 }
 0xd38   :  { %v670_v36 = vpop.permute.xlu1 %669 }
 0xd39   :  { %v672_v38 = vadd.f32 %v670_v36, %v651_v17 }
 0xd3b   :  { %1924 = vtanh.f32 %v672_v38 }
 0xd3c   :  { %v684_v39 = vpop.permute.xlu1 %683 }
 0xd48   :  { %v1925_v40 = vpop.eup %1924 }
 0xd49   :  { %676 = vrot.lane.b32.xlu0 %v1925_v40, %s2027_s12 }
 0xdbb   :  { %v677_v42 = vpop.permute.xlu0 %676 }
 0xdbc   :  { %v679_v45 = vmul.f32 %v677_v42, %v674_v41 }
 0xdbe   :  { %v2297_v46 = vadd.f32 %v680_v44, %v679_v45 }
 0xdc0   :  { %v686_v47 = vsel %vm314_vm3, %v684_v39, %v2297_v46 }
 0xdc1   :  { %v687_v48 = vpack.c.bf16 %v686_v47, %v686_v47 }
 0xdc3   :  { %1688 = vmatmul.mubr.msk.bf16.vlgmr.msra.gmra.mxu1 %vm221_vm4, %v687_v48 }
 0xdc4   :  { %1801 = vmatpush3.bf16.msra.mxu1 %v2177_v54  ;;  %1804 = vmatprep.mubr.msk.bf16.mxu1 %vm2026_vm2, %v2025_v55 }
 0xdc5   :  { %1802 = vmatprep.subr.bf16.mxu1 %v2025_v55 }
 0xdc8   :  { %1803 = vmatpush3.bf16.msra.mxu1 %v2186_v56 }
 0xdc9   :  { %997 = vmatprep.subr.bf16.mxu1 %v2080_v4 }
 0xe83   :  { %v725_v43 = vpop.f32.mrf.mxu1 }
 0xe84   :  { %v726_v49 = vadd.f32 %v725_v43, %v2165_v35 }
 0xe85   :  { %v727_v50 = vpop.f32.mrf.mxu1 }
 0xe86   :  { %740 = vrot.lane.b32.xlu0 %v726_v49, %s2024_s8  ;;  %v732_v53 = vadd.f32 %v726_v49, %v2155_v25  ;;  %v728_v10 = vadd.f32 %v727_v50, %v2148_v19 }
 0xe87   :  { %v729_v51 = vpop.f32.mrf.mxu1 }
 0xe88   :  { %v1689_v57 = vmul.f32 -1.442695, %v732_v53 }
 0xe89   :  { %v730_v52 = vpop.f32.mrf.mxu1 }
 0xe8a   :  { %1926 = vpow2.f32 %v1689_v57 }
 0xe97   :  { %v1927_v58 = vpop.eup %1926 }
 0xe98   :  { %v736_v59 = vadd.f32 1.0, %v1927_v58 }
 0xe9a   :  { %1928 = vrcp.f32 %v736_v59 }
 0xea7   :  { %v1929_v60 = vpop.eup %1928 }
 0xea8   :  { %v750_v27 = vsub.f32 1.0, %v1929_v60  ;;  %v756_v16 = vmul.f32 %v1929_v60, %v2276_v15 }
 0xef8   :  { %v741_v61 = vpop.permute.xlu0 %740 }
 0xef9   :  { %v743_v63 = vmul.f32 %v1929_v60, %v741_v61 }
 0xefb   :  { %745 = vrot.lane.b32.xlu1 %v743_v63, %s2024_s8 }
 0xf6d   :  { %v746_v0 = vpop.permute.xlu1 %745 }
 0xf6e   :  { %v748_v2 = vadd.f32 %v746_v0, %v2155_v25 }
 0xf70   :  { %1930 = vtanh.f32 %v748_v2 }
 0xf7d   :  { %v1931_v3 = vpop.eup %1930 }
 0xf7e   :  { %752 = vrot.lane.b32.xlu0 %v1931_v3, %s2027_s12 }
 0xf82   :  { %813 = vrot.lane.b32.xlu0 %v728_v10, %s2024_s8 }
 0xff0   :  { %v753_v62 = vpop.permute.xlu0 %752 }
 0xff1   :  { %v755_v22 = vmul.f32 %v753_v62, %v750_v27 }
 0xff3   :  { %v2317_v7 = vadd.f32 %v756_v16, %v755_v22 }
 0xff4   :  { %v814_v33 = vpop.permute.xlu0 %813 }
 0xff5   :  { %v758_v17 = vpack.c.bf16 %v2317_v7, %v2317_v7 }
 0xff7   :  { %760 = vrot.lane.b32.xlu1 %v758_v17, %s2027_s12 }
0x1069   :  { %v761_v25 = vpop.permute.xlu1 %760 }
0x106a   :  { %1797 = vmatmul.mubr.msk.bf16.vlgmr.msra.gmra.mxu0 %vm314_vm3, %v761_v25 }
0x106b   :  { %849 = vmatpush1.bf16.msra.mxu0 %v2085_v5  ;;  %872 = vmatprep.mubr.bf16.mxu0 %v2023_v14 }
0x106c   :  { %850 = vmatprep.subr.bf16.mxu0 %v2090_v6 }
0x106f   :  { %851 = vmatpush1.bf16.msra.mxu0 %v2101_v8 }
0x1070   :  { %852 = vmatprep.subr.bf16.mxu0 %v2108_v9 }
0x1073   :  { %853 = vmatpush1.bf16.msra.mxu0 %v2116_v11 }
0x1074   :  { %854 = vmatprep.subr.bf16.mxu0 %v2121_v12 }
0x1077   :  { %855 = vmatpush1.bf16.msra.mxu0 %v2128_v13 }
0x1078   :  { %1808 = vmatprep.subr.bf16.mxu0 %v2025_v55 }
0x112a   :  { %v799_v15 = vpop.f32.mrf.mxu0 }
0x112b   :  { %v800_v18 = vadd.f32 %v2208_v1, %v799_v15 }
0x112c   :  { %v1798_v20 = vpop.f32.mrf.mxu0 }
0x112d   :  { %v805_v21 = vadd.f32 %v800_v18, %v728_v10 }
0x112e   :  { %v802_v23 = vpop.f32.mrf.mxu0 }
0x112f   :  { %v1691_v24 = vmul.f32 -1.442695, %v805_v21 }
0x1130   :  { %v1799_v26 = vpop.f32.mrf.mxu0 }
0x1131   :  { %1932 = vpow2.f32 %v1691_v24 }
0x113e   :  { %v1933_v28 = vpop.eup %1932 }
0x113f   :  { %v809_v30 = vadd.f32 1.0, %v1933_v28 }
0x1141   :  { %1934 = vrcp.f32 %v809_v30 }
0x114e   :  { %v1935_v31 = vpop.eup %1934 }
0x114f   :  { %v816_v36 = vmul.f32 %v1935_v31, %v814_v33  ;;  %v823_v42 = vsub.f32 1.0, %v1935_v31  ;;  %v829_v45 = vmul.f32 %v1935_v31, %v2297_v46 }
0x1151   :  { %818 = vrot.lane.b32.xlu1 %v816_v36, %s2024_s8 }
0x1155   :  { %832 = vrot.lane.b32.xlu1 %v2317_v7, %s2027_s12 }
0x11c3   :  { %v819_v38 = vpop.permute.xlu1 %818 }
0x11c4   :  { %v821_v40 = vadd.f32 %v819_v38, %v800_v18 }
0x11c6   :  { %1936 = vtanh.f32 %v821_v40 }
0x11c7   :  { %v833_v48 = vpop.permute.xlu1 %832 }
0x11d3   :  { %v1937_v41 = vpop.eup %1936 }
0x11d4   :  { %825 = vrot.lane.b32.xlu0 %v1937_v41, %s2027_s12 }
0x1246   :  { %v826_v44 = vpop.permute.xlu0 %825 }
0x1247   :  { %v828_v39 = vmul.f32 %v826_v44, %v823_v42 }
0x1249   :  { %v2338_v47 = vadd.f32 %v829_v45, %v828_v39 }
0x124b   :  { %v835_v43 = vsel %vm314_vm3, %v833_v48, %v2338_v47 }
0x124c   :  { %v836_v49 = vpack.c.bf16 %v835_v43, %v835_v43 }
0x124e   :  { %1692 = vmatmul.mubr.msk.bf16.vlgmr.msra.gmra.mxu0 %vm221_vm4, %v836_v49 }
0x124f   :  { %1809 = vmatpush3.bf16.msra.mxu0 %v2177_v54  ;;  %1812 = vmatprep.mubr.msk.bf16.mxu0 %vm2026_vm2, %v2025_v55 }
0x1250   :  { %1810 = vmatprep.subr.bf16.mxu0 %v2025_v55 }
0x1253   :  { %1811 = vmatpush3.bf16.msra.mxu0 %v2186_v56 }
0x1254   :  { %1146 = vmatprep.subr.bf16.mxu0 %v2080_v4 }
0x130e   :  { %v874_v46 = vpop.f32.mrf.mxu0 }
0x130f   :  { %v875_v50 = vadd.f32 %v874_v46, %v2165_v35 }
0x1310   :  { %v876_v51 = vpop.f32.mrf.mxu0 }
0x1311   :  { %889 = vrot.lane.b32.xlu0 %v875_v50, %s2024_s8  ;;  %v881_v57 = vadd.f32 %v875_v50, %v2161_v32  ;;  %v877_v27 = vadd.f32 %v876_v51, %v2148_v19 }
0x1312   :  { %v878_v52 = vpop.f32.mrf.mxu0 }
0x1313   :  { %v1693_v58 = vmul.f32 -1.442695, %v881_v57 }
0x1314   :  { %v879_v53 = vpop.f32.mrf.mxu0 }
0x1315   :  { %1938 = vpow2.f32 %v1693_v58 }
0x1322   :  { %v1939_v59 = vpop.eup %1938 }
0x1323   :  { %v885_v60 = vadd.f32 1.0, %v1939_v59 }
0x1325   :  { %1940 = vrcp.f32 %v885_v60 }
0x1332   :  { %v1941_v61 = vpop.eup %1940 }
0x1333   :  { %v899_v62 = vsub.f32 1.0, %v1941_v61  ;;  %v905_v22 = vmul.f32 %v1941_v61, %v2317_v7 }
0x1383   :  { %v890_v63 = vpop.permute.xlu0 %889 }
0x1384   :  { %v892_v0 = vmul.f32 %v1941_v61, %v890_v63 }
0x1386   :  { %894 = vrot.lane.b32.xlu1 %v892_v0, %s2024_s8 }
0x13f8   :  { %v895_v2 = vpop.permute.xlu1 %894 }
0x13f9   :  { %v897_v3 = vadd.f32 %v895_v2, %v2161_v32 }
0x13fb   :  { %1942 = vtanh.f32 %v897_v3 }
0x1408   :  { %v1943_v10 = vpop.eup %1942 }
0x1409   :  { %901 = vrot.lane.b32.xlu0 %v1943_v10, %s2027_s12 }
0x140d   :  { %962 = vrot.lane.b32.xlu0 %v877_v27, %s2024_s8 }
0x147b   :  { %v902_v16 = vpop.permute.xlu0 %901 }
0x147c   :  { %v904_v17 = vmul.f32 %v902_v16, %v899_v62 }
0x147e   :  { %v2358_v25 = vadd.f32 %v905_v22, %v904_v17 }
0x147f   :  { %v963_v33 = vpop.permute.xlu0 %962 }
0x1480   :  { %v907_v15 = vpack.c.bf16 %v2358_v25, %v2358_v25 }
0x1482   :  { %909 = vrot.lane.b32.xlu1 %v907_v15, %s2027_s12 }
0x14f4   :  { %v910_v32 = vpop.permute.xlu1 %909 }
0x14f5   :  { %1805 = vmatmul.mubr.msk.bf16.vlgmr.msra.gmra.mxu1 %vm314_vm3, %v910_v32 }
0x14f6   :  { %998 = vmatpush1.bf16.msra.mxu1 %v2085_v5  ;;  %1021 = vmatprep.mubr.bf16.mxu1 %v2023_v14 }
0x14f7   :  { %999 = vmatprep.subr.bf16.mxu1 %v2090_v6 }
0x14fa   :  { %1000 = vmatpush1.bf16.msra.mxu1 %v2101_v8 }
0x14fb   :  { %1001 = vmatprep.subr.bf16.mxu1 %v2108_v9 }
0x14fe   :  { %1002 = vmatpush1.bf16.msra.mxu1 %v2116_v11 }
0x14ff   :  { %1003 = vmatprep.subr.bf16.mxu1 %v2121_v12 }
0x1502   :  { %1004 = vmatpush1.bf16.msra.mxu1 %v2128_v13 }
0x1503   :  { %1816 = vmatprep.subr.bf16.mxu1 %v2025_v55 }
0x15b5   :  { %v948_v7 = vpop.f32.mrf.mxu1 }
0x15b6   :  { %v949_v18 = vadd.f32 %v2208_v1, %v948_v7 }
0x15b7   :  { %v1806_v20 = vpop.f32.mrf.mxu1 }
0x15b8   :  { %v954_v21 = vadd.f32 %v949_v18, %v877_v27 }
0x15b9   :  { %v951_v23 = vpop.f32.mrf.mxu1 }
0x15ba   :  { %v1695_v24 = vmul.f32 -1.442695, %v954_v21 }
0x15bb   :  { %v1807_v26 = vpop.f32.mrf.mxu1 }
0x15bc   :  { %1944 = vpow2.f32 %v1695_v24 }
0x15c9   :  { %v1945_v28 = vpop.eup %1944 }
0x15ca   :  { %v958_v30 = vadd.f32 1.0, %v1945_v28 }
0x15cc   :  { %1946 = vrcp.f32 %v958_v30 }
0x15d9   :  { %v1947_v31 = vpop.eup %1946 }
0x15da   :  { %v965_v36 = vmul.f32 %v1947_v31, %v963_v33  ;;  %v972_v42 = vsub.f32 1.0, %v1947_v31  ;;  %v978_v45 = vmul.f32 %v1947_v31, %v2338_v47 }
0x15dc   :  { %967 = vrot.lane.b32.xlu1 %v965_v36, %s2024_s8 }
0x15e0   :  { %981 = vrot.lane.b32.xlu1 %v2358_v25, %s2027_s12 }
0x164e   :  { %v968_v38 = vpop.permute.xlu1 %967 }
0x164f   :  { %v970_v40 = vadd.f32 %v968_v38, %v949_v18 }
0x1651   :  { %1948 = vtanh.f32 %v970_v40 }
0x1652   :  { %v982_v43 = vpop.permute.xlu1 %981 }
0x165e   :  { %v1949_v41 = vpop.eup %1948 }
0x165f   :  { %974 = vrot.lane.b32.xlu0 %v1949_v41, %s2027_s12 }
0x16d1   :  { %v975_v44 = vpop.permute.xlu0 %974 }
0x16d2   :  { %v977_v39 = vmul.f32 %v975_v44, %v972_v42 }
0x16d4   :  { %v2379_v48 = vadd.f32 %v978_v45, %v977_v39 }
0x16d6   :  { %v984_v49 = vsel %vm314_vm3, %v982_v43, %v2379_v48 }
0x16d7   :  { %v985_v46 = vpack.c.bf16 %v984_v49, %v984_v49 }
0x16d9   :  { %1696 = vmatmul.mubr.msk.bf16.vlgmr.msra.gmra.mxu1 %vm221_vm4, %v985_v46 }
0x16da   :  { %1817 = vmatpush3.bf16.msra.mxu1 %v2177_v54  ;;  %1820 = vmatprep.mubr.msk.bf16.mxu1 %vm2026_vm2, %v2025_v55 }
0x16db   :  { %1818 = vmatprep.subr.bf16.mxu1 %v2025_v55 }
0x16de   :  { %1819 = vmatpush3.bf16.msra.mxu1 %v2186_v56 }
0x16df   :  { %1295 = vmatprep.subr.bf16.mxu1 %v2080_v4 }
0x1799   :  { %v1023_v47 = vpop.f32.mrf.mxu1 }
0x179a   :  { %v1024_v50 = vadd.f32 %v1023_v47, %v2165_v35 }
0x179b   :  { %v1025_v51 = vpop.f32.mrf.mxu1 }
0x179c   :  { %1038 = vrot.lane.b32.xlu0 %v1024_v50, %s2024_s8  ;;  %v1030_v57 = vadd.f32 %v1024_v50, %v2167_v37  ;;  %v1026_v10 = vadd.f32 %v1025_v51, %v2148_v19 }
0x179d   :  { %v1027_v52 = vpop.f32.mrf.mxu1 }
0x179e   :  { %v1697_v58 = vmul.f32 -1.442695, %v1030_v57 }
0x179f   :  { %v1028_v53 = vpop.f32.mrf.mxu1 }
0x17a0   :  { %1950 = vpow2.f32 %v1697_v58 }
0x17ad   :  { %v1951_v59 = vpop.eup %1950 }
0x17ae   :  { %v1034_v60 = vadd.f32 1.0, %v1951_v59 }
0x17b0   :  { %1952 = vrcp.f32 %v1034_v60 }
0x17bd   :  { %v1953_v61 = vpop.eup %1952 }
0x17be   :  { %v1048_v27 = vsub.f32 1.0, %v1953_v61  ;;  %v1054_v16 = vmul.f32 %v1953_v61, %v2358_v25 }
0x180e   :  { %v1039_v63 = vpop.permute.xlu0 %1038 }
0x180f   :  { %v1041_v0 = vmul.f32 %v1953_v61, %v1039_v63 }
0x1811   :  { %1043 = vrot.lane.b32.xlu1 %v1041_v0, %s2024_s8  ;;  %v1990_v0 = vld [vmem:[%s2530_s2 + $0x68] ss:$16 sps:$4 sm:$0xff]  }
0x1883   :  { %v1044_v4 = vpop.permute.xlu1 %1043 }
0x1884   :  { %v1046_v2 = vadd.f32 %v1044_v4, %v2167_v37  ;;  %v1991_v4 = vld [vmem:[%s2530_s2 + $0x4c] ss:$16 sps:$4 sm:$0xff]  }
0x1886   :  { %1954 = vtanh.f32 %v1046_v2  ;;  %v1992_v2 = vld [vmem:[%s2530_s2 + $0x48] ss:$16 sps:$4 sm:$0xff]  }
0x1893   :  { %v1955_v3 = vpop.eup %1954 }
0x1894   :  { %1050 = vrot.lane.b32.xlu0 %v1955_v3, %s2027_s12  ;;  %v1993_v3 = vld [vmem:[%s2530_s2 + $0x2c] ss:$16 sps:$4 sm:$0xff]  }
0x1898   :  { %1111 = vrot.lane.b32.xlu0 %v1026_v10, %s2024_s8 }
0x1906   :  { %v1051_v62 = vpop.permute.xlu0 %1050 }
0x1907   :  { %v1053_v22 = vmul.f32 %v1051_v62, %v1048_v27  ;;  %v1996_v27 = vld [vmem:[%s2530_s2 + $0x8] ss:$16 sps:$4 sm:$0xff]  }
0x1909   :  { %v2399_v17 = vadd.f32 %v1054_v16, %v1053_v22 }
0x190b   :  { %v1056_v15 = vpack.c.bf16 %v2399_v17, %v2399_v17 }
0x190d   :  { %1058 = vrot.lane.b32.xlu1 %v1056_v15, %s2027_s12 }
0x197f   :  { %v1059_v37 = vpop.permute.xlu1 %1058 }
0x1980   :  { %1813 = vmatmul.mubr.msk.bf16.vlgmr.msra.gmra.mxu0 %vm314_vm3, %v1059_v37 }
0x1981   :  { %1147 = vmatpush1.bf16.msra.mxu0 %v2085_v5  ;;  %1170 = vmatprep.mubr.bf16.mxu0 %v2023_v14 }
0x1982   :  { %1148 = vmatprep.subr.bf16.mxu0 %v2090_v6 }
0x1985   :  { %1149 = vmatpush1.bf16.msra.mxu0 %v2101_v8 }
0x1986   :  { %1150 = vmatprep.subr.bf16.mxu0 %v2108_v9 }
0x1989   :  { %1151 = vmatpush1.bf16.msra.mxu0 %v2116_v11  ;;  %v1112_v11 = vpop.permute.xlu0 %1111 }
0x198a   :  { %1152 = vmatprep.subr.bf16.mxu0 %v2121_v12 }
0x198d   :  { %1153 = vmatpush1.bf16.msra.mxu0 %v2128_v13 }
0x198e   :  { %1824 = vmatprep.subr.bf16.mxu0 %v2025_v55 }
0x1a40   :  { %v1097_v25 = vpop.f32.mrf.mxu0 }
0x1a41   :  { %v1098_v32 = vadd.f32 %v2208_v1, %v1097_v25 }
0x1a42   :  { %v1814_v5 = vpop.f32.mrf.mxu0 }
0x1a43   :  { %v1103_v7 = vadd.f32 %v1098_v32, %v1026_v10  ;;  %v1994_v10 = vld [vmem:[%s2530_s2 + $0x28] ss:$16 sps:$4 sm:$0xff]  }
0x1a44   :  { %v1100_v18 = vpop.f32.mrf.mxu0 }
0x1a45   :  { %v1699_v20 = vmul.f32 -1.442695, %v1103_v7 }
0x1a46   :  { %v1815_v6 = vpop.f32.mrf.mxu0 }
0x1a47   :  { %1956 = vpow2.f32 %v1699_v20 }
0x1a54   :  { %v1957_v8 = vpop.eup %1956 }
0x1a55   :  { %v1107_v21 = vadd.f32 1.0, %v1957_v8 }
0x1a57   :  { %1958 = vrcp.f32 %v1107_v21 }
0x1a64   :  { %v1959_v9 = vpop.eup %1958 }
0x1a65   :  { %v1114_v23 = vmul.f32 %v1959_v9, %v1112_v11  ;;  %v1121_v26 = vsub.f32 1.0, %v1959_v9  ;;  %v1127_v30 = vmul.f32 %v1959_v9, %v2379_v48 }
0x1a67   :  { %1116 = vrot.lane.b32.xlu1 %v1114_v23, %s2024_s8 }
0x1a6b   :  { %1130 = vrot.lane.b32.xlu1 %v2399_v17, %s2027_s12 }
0x1ad9   :  { %v1117_v12 = vpop.permute.xlu1 %1116 }
0x1ada   :  { %v1119_v13 = vadd.f32 %v1117_v12, %v1098_v32 }
0x1adc   :  { %1960 = vtanh.f32 %v1119_v13 }
0x1add   :  { %v1131_v36 = vpop.permute.xlu1 %1130 }
0x1ae9   :  { %v1961_v24 = vpop.eup %1960 }
0x1aea   :  { %1123 = vrot.lane.b32.xlu0 %v1961_v24, %s2027_s12 }
0x1b5c   :  { %v1124_v28 = vpop.permute.xlu0 %1123 }
0x1b5d   :  { %v1126_v31 = vmul.f32 %v1124_v28, %v1121_v26 }
0x1b5f   :  { %v2420_v33 = vadd.f32 %v1127_v30, %v1126_v31 }
0x1b61   :  { %v1133_v38 = vsel %vm314_vm3, %v1131_v36, %v2420_v33 }
0x1b62   :  { %v1134_v40 = vpack.c.bf16 %v1133_v38, %v1133_v38 }
0x1b64   :  { %1700 = vmatmul.mubr.msk.bf16.vlgmr.msra.gmra.mxu0 %vm221_vm4, %v1134_v40 }
0x1b65   :  { %1825 = vmatpush3.bf16.msra.mxu0 %v2177_v54  ;;  %1828 = vmatprep.mubr.msk.bf16.mxu0 %vm2026_vm2, %v2025_v55 }
0x1b66   :  { %1826 = vmatprep.subr.bf16.mxu0 %v2025_v55 }
0x1b69   :  { %1827 = vmatpush3.bf16.msra.mxu0 %v2186_v56 }
0x1b6a   :  { %1832 = vmatprep.subr.bf16.mxu0 %v2025_v55 }
0x1c24   :  { %v1172_v41 = vpop.f32.mrf.mxu0 }
0x1c25   :  { %v1173_v42 = vadd.f32 %v1172_v41, %v2165_v35 }
0x1c26   :  { %v1174_v44 = vpop.f32.mrf.mxu0 }
0x1c27   :  { %1187 = vrot.lane.b32.xlu0 %v1173_v42, %s2024_s8  ;;  %v1179_v48 = vadd.f32 %v1173_v42, %v2159_v29  ;;  %v1175_v53 = vadd.f32 %v1174_v44, %v2148_v19 }
0x1c28   :  { %v1176_v45 = vpop.f32.mrf.mxu0 }
0x1c29   :  { %v1701_v54 = vmul.f32 -1.442695, %v1179_v48 }
0x1c2a   :  { %v1177_v39 = vpop.f32.mrf.mxu0 }
0x1c2b   :  { %1962 = vpow2.f32 %v1701_v54 }
0x1c38   :  { %v1963_v43 = vpop.eup %1962 }
0x1c39   :  { %v1183_v49 = vadd.f32 1.0, %v1963_v43 }
0x1c3b   :  { %1964 = vrcp.f32 %v1183_v49 }
0x1c48   :  { %v1965_v46 = vpop.eup %1964 }
0x1c49   :  { %v1197_v57 = vsub.f32 1.0, %v1965_v46  ;;  %v1203_v59 = vmul.f32 %v1965_v46, %v2399_v17 }
0x1c99   :  { %v1188_v47 = vpop.permute.xlu0 %1187 }
0x1c9a   :  { %v1190_v56 = vmul.f32 %v1965_v46, %v1188_v47 }
0x1c9c   :  { %1192 = vrot.lane.b32.xlu1 %v1190_v56, %s2024_s8 }
0x1d0e   :  { %v1193_v50 = vpop.permute.xlu1 %1192 }
0x1d0f   :  { %v1195_v51 = vadd.f32 %v1193_v50, %v2159_v29 }
0x1d11   :  { %1966 = vtanh.f32 %v1195_v51 }
0x1d1e   :  { %v1967_v52 = vpop.eup %1966 }
0x1d1f   :  { %1199 = vrot.lane.b32.xlu0 %v1967_v52, %s2027_s12 }
0x1d23   :  { %1260 = vrot.lane.b32.xlu0 %v1175_v53, %s2024_s8 }
0x1d91   :  { %v1200_v58 = vpop.permute.xlu0 %1199 }
0x1d92   :  { %v1202_v60 = vmul.f32 %v1200_v58, %v1197_v57 }
0x1d94   :  { %v2440_v61 = vadd.f32 %v1203_v59, %v1202_v60 }
0x1d95   :  { %v1261_v18 = vpop.permute.xlu0 %1260 }
0x1d96   :  { %v1205_v63 = vpack.c.bf16 %v2440_v61, %v2440_v61 }
0x1d98   :  { %1207 = vrot.lane.b32.xlu1 %v1205_v63, %s2027_s12 }
0x1e0a   :  { %v1208_v29 = vpop.permute.xlu1 %1207 }
0x1e0b   :  { %1821 = vmatmul.mubr.msk.bf16.vlgmr.msra.gmra.mxu1 %vm314_vm3, %v1208_v29 }
0x1e0c   :  { %1296 = vmatpush1.bf16.msra.mxu1 %v1990_v0  ;;  %1319 = vmatprep.mubr.bf16.mxu1 %v2023_v14  ;;  %v1995_v14 = vld [vmem:[%s2530_s2 + $0xc] ss:$16 sps:$4 sm:$0xff]  }
0x1e0d   :  { %1297 = vmatprep.subr.bf16.mxu1 %v1991_v4 }
0x1e10   :  { %1298 = vmatpush1.bf16.msra.mxu1 %v1992_v2 }
0x1e11   :  { %1299 = vmatprep.subr.bf16.mxu1 %v1993_v3 }
0x1e14   :  { %1300 = vmatpush1.bf16.msra.mxu1 %v1994_v10 }
0x1e15   :  { %1301 = vmatprep.subr.bf16.mxu1 %v1995_v14  ;;  %v1884_v14 = vld [vmem:[#allocation2 + $0x30] ss:$12 sps:$4 sm:$0xff]  }
0x1e18   :  { %1302 = vmatpush1.bf16.msra.mxu1 %v1996_v27  ;;  %v1885_v27 = vld [vmem:[#allocation2 + $0x18] ss:$12 sps:$4 sm:$0xff]  }
0x1e19   :  { %1842 = vmatprep.subr.bf16.mxu1 %v2025_v55 }
0x1ecb   :  { %v1246_v62 = vpop.f32.mrf.mxu1 }
0x1ecc   :  { %v1247_v16 = vadd.f32 %v2208_v1, %v1246_v62 }
0x1ecd   :  { %v1822_v22 = vpop.f32.mrf.mxu1 }
0x1ece   :  { %v1252_v17 = vadd.f32 %v1247_v16, %v1175_v53 }
0x1ecf   :  { %v1249_v15 = vpop.f32.mrf.mxu1 }
0x1ed0   :  { %v1703_v37 = vmul.f32 -1.442695, %v1252_v17 }
0x1ed1   :  { %v1823_v25 = vpop.f32.mrf.mxu1 }
0x1ed2   :  { %1968 = vpow2.f32 %v1703_v37 }
0x1edf   :  { %v1969_v32 = vpop.eup %1968 }
0x1ee0   :  { %v1256_v5 = vadd.f32 1.0, %v1969_v32  ;;  %v1442_v32 = vld [vmem:[%s2529_s1] sm:$0xff] }
0x1ee2   :  { %1970 = vrcp.f32 %v1256_v5 }
0x1eef   :  { %v1971_v7 = vpop.eup %1970 }
0x1ef0   :  { %v1263_v20 = vmul.f32 %v1971_v7, %v1261_v18  ;;  %v1270_v21 = vsub.f32 1.0, %v1971_v7  ;;  %v1276_v11 = vmul.f32 %v1971_v7, %v2420_v33 }
0x1ef2   :  { %1265 = vrot.lane.b32.xlu1 %v1263_v20, %s2024_s8  ;;  %v1887_v20 = vld [vmem:[#allocation2 + $0x1c] ss:$12 sps:$4 sm:$0xff]  }
0x1ef6   :  { %1279 = vrot.lane.b32.xlu1 %v2440_v61, %s2027_s12 }
0x1f64   :  { %v1266_v6 = vpop.permute.xlu1 %1265 }
0x1f65   :  { %v1268_v8 = vadd.f32 %v1266_v6, %v1247_v16  ;;  %v1886_v16 = vld [vmem:[#allocation2] ss:$12 sps:$4 sm:$0xff]   ;;  %v1888_v6 = vld [vmem:[#allocation2 + $0x4] ss:$12 sps:$4 sm:$0xff]  }
0x1f67   :  { %1972 = vtanh.f32 %v1268_v8  ;;  %v1708_v8 = vld [vmem:[%s2533_s5] ss:$0 sm:$0xff] }
0x1f68   :  { %v1280_v13 = vpop.permute.xlu1 %1279 }
0x1f74   :  { %v1973_v1 = vpop.eup %1972 }
0x1f75   :  { %1272 = vrot.lane.b32.xlu0 %v1973_v1, %s2027_s12 }
0x1fe7   :  { %v1273_v9 = vpop.permute.xlu0 %1272 }
0x1fe8   :  { %v1275_v23 = vmul.f32 %v1273_v9, %v1270_v21 }
0x1fea   :  { %v2475_v12 = vadd.f32 %v1276_v11, %v1275_v23 }
0x1fec   :  { %v1282_v24 = vsel %vm314_vm3, %v1280_v13, %v2475_v12 }
0x1fed   :  { %v1283_v26 = vpack.c.bf16 %v1282_v24, %v1282_v24  ;;  %v1889_v24 = vld [vmem:[#allocation2 + $0x8] ss:$12 sps:$4 sm:$0xff]  }
0x1fef   :  { %1704 = vmatmul.mubr.msk.bf16.vlgmr.msra.gmra.mxu1 %vm221_vm4, %v1283_v26 }
0x1ff0   :  { %1846 = vmatprep.mubr.msk.bf16.mxu1 %vm2026_vm2, %v2025_v55  ;;  %1843 = vmatpush3.bf16.msra.mxu1 %v1887_v20 }
0x1ff1   :  { %1844 = vmatprep.subr.bf16.mxu1 %v2025_v55 }
0x1ff4   :  { %1845 = vmatpush3.bf16.msra.mxu1 %v1888_v6 }
0x20af   :  { %v1321_v28 = vpop.f32.mrf.mxu1 }
0x20b0   :  { %v1322_v30 = vadd.f32 %v1321_v28, %v2165_v35 }
0x20b1   :  { %v1323_v31 = vpop.f32.mrf.mxu1 }
0x20b2   :  { %1336 = vrot.lane.b32.xlu0 %v1322_v30, %s2024_s8  ;;  %v1328_v38 = vadd.f32 %v1322_v30, %v2163_v34  ;;  %v1324_v43 = vadd.f32 %v1323_v31, %v2148_v19  ;;  %v1997_v19 = vld [vmem:[%s2531_s3 + $0x3] ss:$0 sm:$0xff]  ;;  %s2028_s3 = smov 112  }
0x20b3   :  { %v1325_v33 = vpop.f32.mrf.mxu1 }
0x20b4   :  { %v1705_v40 = vmul.f32 -1.442695, %v1328_v38 }
0x20b5   :  { %v1326_v36 = vpop.f32.mrf.mxu1 }
0x20b6   :  { %1974 = vpow2.f32 %v1705_v40  ;;  %v1717_v40 = vld [vmem:[%s2533_s5 + $0x2] ss:$0 sm:$0xff] }
0x20c3   :  { %v1975_v41 = vpop.eup %1974 }
0x20c4   :  { %v1332_v42 = vadd.f32 1.0, %v1975_v41 }
0x20c6   :  { %1976 = vrcp.f32 %v1332_v42 }
0x20d3   :  { %v1977_v44 = vpop.eup %1976 }
0x20d4   :  { %v1346_v49 = vsub.f32 1.0, %v1977_v44  ;;  %v1352_v47 = vmul.f32 %v1977_v44, %v2440_v61 }
0x2124   :  { %v1337_v45 = vpop.permute.xlu0 %1336 }
0x2125   :  { %v1339_v39 = vmul.f32 %v1977_v44, %v1337_v45 }
0x2127   :  { %1341 = vrot.lane.b32.xlu1 %v1339_v39, %s2024_s8 }
0x2199   :  { %v1342_v48 = vpop.permute.xlu1 %1341 }
0x219a   :  { %v1344_v35 = vadd.f32 %v1342_v48, %v2163_v34 }
0x219c   :  { %1978 = vtanh.f32 %v1344_v35 }
0x21a9   :  { %v1979_v54 = vpop.eup %1978 }
0x21aa   :  { %1348 = vrot.lane.b32.xlu0 %v1979_v54, %s2027_s12 }
0x21ae   :  { %1409 = vrot.lane.b32.xlu0 %v1324_v43, %s2024_s8 }
0x221c   :  { %v1349_v46 = vpop.permute.xlu0 %1348 }
0x221d   :  { %v1351_v56 = vmul.f32 %v1349_v46, %v1346_v49 }
0x221f   :  { %v1353_v50 = vadd.f32 %v1352_v47, %v1351_v56 }
0x2220   :  { %v1410_v4 = vpop.permute.xlu0 %1409 }
0x2221   :  { %v1354_v51 = vpack.c.bf16 %v1353_v50, %v1353_v50 }
0x2223   :  { %1356 = vrot.lane.b32.xlu1 %v1354_v51, %s2027_s12 }
0x2295   :  { %v1357_v52 = vpop.permute.xlu1 %1356 }
0x2296   :  { %1829 = vmatmul.mubr.msk.bf16.vlgmr.msra.gmra.mxu0 %vm314_vm3, %v1357_v52 }
0x2297   :  { %1838 = vmatprep.mubr.msk.bf16.mxu0 %vm2026_vm2, %v2025_v55  ;;  %1833 = vmatpush3.bf16.msra.mxu0 %v1884_v14 }
0x2298   :  { %1834 = vmatprep.subr.bf16.mxu0 %v2025_v55 }
0x229b   :  { %1835 = vmatpush3.bf16.msra.mxu0 %v1885_v27 }
0x229c   :  { %1836 = vmatprep.subr.bf16.mxu0 %v2025_v55 }
0x229f   :  { %1837 = vmatpush3.bf16.msra.mxu0 %v1886_v16 }
0x22a0   :  { %1850 = vmatprep.subr.bf16.mxu0 %v2025_v55 }
0x2356   :  { %v1395_v34 = vpop.f32.mrf.mxu0 }
0x2357   :  { %v1396_v53 = vadd.f32 %v1997_v19, %v1395_v34 }
0x2358   :  { %v1830_v57 = vpop.f32.mrf.mxu0 }
0x2359   :  { %v1401_v58 = vadd.f32 %v1396_v53, %v1324_v43 }
0x235a   :  { %v1398_v59 = vpop.f32.mrf.mxu0 }
0x235b   :  { %v1707_v60 = vmul.f32 -1.442695, %v1401_v58 }
0x235c   :  { %v1831_v61 = vpop.f32.mrf.mxu0 }
0x235d   :  { %1980 = vpow2.f32 %v1707_v60 }
0x236a   :  { %v1981_v63 = vpop.eup %1980 }
0x236b   :  { %v1405_v29 = vadd.f32 1.0, %v1981_v63 }
0x236d   :  { %1982 = vrcp.f32 %v1405_v29 }
0x237a   :  { %v1983_v0 = vpop.eup %1982 }
0x237b   :  { %v1412_v2 = vmul.f32 %v1983_v0, %v1410_v4  ;;  %v1419_v22 = vsub.f32 1.0, %v1983_v0  ;;  %v1425_v15 = vmul.f32 %v1983_v0, %v2475_v12 }
0x237d   :  { %1414 = vrot.lane.b32.xlu1 %v1412_v2, %s2024_s8 }
0x23ef   :  { %v1415_v3 = vpop.permute.xlu1 %1414 }
0x23f0   :  { %v1417_v10 = vadd.f32 %v1415_v3, %v1396_v53 }
0x23f2   :  { %1984 = vtanh.f32 %v1417_v10 }
0x23ff   :  { %v1985_v62 = vpop.eup %1984 }
0x2400   :  { %1421 = vrot.lane.b32.xlu0 %v1985_v62, %s2027_s12 }
0x2472   :  { %v1422_v17 = vpop.permute.xlu0 %1421 }
0x2473   :  { %v1424_v37 = vmul.f32 %v1422_v17, %v1419_v22 }
0x2475   :  { %v1426_v25 = vadd.f32 %v1425_v15, %v1424_v37 }
0x2477   :  { %1444 = vrot.lane.b32.xlu1 %v1426_v25, %s2028_s3 }
0x24e9   :  { %v1445_v5 = vpop.permute.xlu1 %1444 }
0x24ea   :  { %v1448_v7 = vsel %vm1447_vm5, %v1442_v32, %v1445_v5 }
0x24eb   :  { %v1449_v18 = vpack.c.bf16 %v1448_v7, %v1448_v7 }
0x24ed   :  { %1839 = vmatmul.mubr.msk.bf16.vlgmr.msra.gmra.mxu0 %vm1474_vm6, %v1449_v18 }
0x24ee   :  { %1852 = vmatprep.mubr.msk.bf16.mxu0 %vm2026_vm2, %v2025_v55  ;;  %1851 = vmatpush3.bf16.msra.mxu0 %v1889_v24  ;;  %v1713_v55 = vld [vmem:[%s2533_s5 + $0x1] ss:$0 sm:$0xff] }
0x25ad   :  { %v1512_v1 = vpop.f32.mrf.mxu0 }
0x25ae   :  { %v1513_v21 = vadd.f32 %v1708_v8, %v1512_v1 }
0x25af   :  { %v1840_v9 = vpop.f32.mrf.mxu0 }
0x25b0   :  { %v1518_v11 = vmax.f32 %v1513_v21, 0.0 }
0x25b1   :  { %v1515_v23 = vpop.f32.mrf.mxu0 }
0x25b2   :  { %v1519_v12 = vpack.c.bf16 %v1518_v11, %v1518_v11 }
0x25b3   :  { %v1841_v13 = vpop.f32.mrf.mxu0 }
0x25b4   :  { %1847 = vmatmul.mubr.msk.bf16.vlgmr.msra.gmra.mxu1 %vm314_vm3, %v1519_v12 }
0x2674   :  { %v1575_v26 = vpop.f32.mrf.mxu1 }
0x2675   :  { %v1576_v28 = vadd.f32 %v1713_v55, %v1575_v26 }
0x2676   :  { %v1848_v30 = vpop.f32.mrf.mxu1 }
0x2677   :  { %v1581_v31 = vmax.f32 %v1576_v28, 0.0 }
0x2678   :  { %v1578_v33 = vpop.f32.mrf.mxu1 }
0x2679   :  { %v1582_v36 = vpack.c.bf16 %v1581_v31, %v1581_v31 }
0x267a   :  { %v1849_v38 = vpop.f32.mrf.mxu1 }
0x267b   :  { %1853 = vmatmul.mubr.msk.bf16.vlgmr.msra.gmra.mxu0 %vm1447_vm5, %v1582_v36 }
0x273b   :  { %v1632_v41 = vpop.f32.mrf.mxu0 }
0x273c   :  { %v1633_v42 = vadd.f32 %v1717_v40, %v1632_v41 }
0x273d   :  { %v1854_v44 = vpop.f32.mrf.mxu0 }
0x273e   :  { %v1639_v45 = vsel %vm1638_vm7, %v1633_v42, -inf }
0x273f   :  { %1640 = vmax.xlane.f32.xlu0 %v1639_v45  ;;  %v1635_v39 = vpop.f32.mrf.mxu0 }
0x2741   :  { %v1855_v48 = vpop.f32.mrf.mxu0 }
0x27c8   :  { %v1641_v35 = vpop.xlane.xlu0 %1640 }
0x27c9   :  { %v1642_v54 = vsub.f32 %v1633_v42, %v1641_v35 }
0x27cb   :  { %v1643_v43 = vmul.f32 1.442695, %v1642_v54 }
0x27cd   :  { %1986 = vpow2.f32 %v1643_v43 }
0x27da   :  { %v1987_v49 = vpop.eup %1986 }
0x27db   :  { %v1645_v46 = vsel %vm1638_vm7, %v1987_v49, 0.0 }
0x27dc   :  { %1646 = vadd.xlane.f32.xlu1 %v1645_v46 }
0x2865   :  { %v1647_v47 = vpop.xlane.xlu1 %1646 }
0x2866   :  { %1988 = vlog2.f32 %v1647_v47 }
0x2873   :  { %v1989_v56 = vpop.eup %1988 }
0x2874   :  { %v1649_v50 = vmul.f32 0.6931472, %v1989_v56 }
0x2876   :  { %v1650_v51 = vsub.f32 %v1642_v54, %v1649_v50 }
0x2878   :  { %1651 = vst.msk [vmem:[%s2534_s6] sm:$0xff] %vm1638_vm7, %v1650_v51 }
0x2879   :  { %1656 = vsyncpa [#allocation3], 1 }

</bundles_post_ra>
